<compile_context>
chip_gen: v7x
topology: tpu7x:2x2x1
jax: 0.10.0
libtpu: 0.0.40
codegen_flags: <defaults>
</compile_context>

<pallas_src>
import math
import functools

import jax
import jax.numpy as jnp
from jax import lax
from jax.experimental import pallas as pl
from jax.experimental.pallas import tpu as pltpu


# ---------------------------------------------------------------------------
# Kernels
# ---------------------------------------------------------------------------

def attn_layer_kernel(x_ref, kbias_ref, wq_ref, wk_ref, wv_ref,
                      wo_ref, bo_ref, g_ref, beta_ref,
                      out_ref, acc_ref, *, head_dim, eps):
    """One grid step = (batch b, head h).  Heads accumulate into acc_ref.

    x_ref:     (1, L, D)   self-attention input (query = key = value)
    kbias_ref: (1, 1, L)   additive key bias (0 visible / -10000 masked)
    wq/wk/wv:  (H, D, hd)  per-head projection weights (resident in VMEM)
    wo_ref:    (H, hd, D)  per-head slice of the output projection
    bo_ref:    (1, D)      output projection bias
    g_ref/beta_ref: (1, D) LayerNorm1 affine params
    out_ref:   (1, L, D)   LayerNorm1(x + attention(x))
    acc_ref:   (L, D) f32  VMEM accumulator over heads
    """
    h = pl.program_id(1)

    x = x_ref[0]                                   # (L, D), native dtype
    wq = wq_ref[h]                                 # (D, hd)
    wk = wk_ref[h]
    wv = wv_ref[h]

    # Per-head Q/K/V projections (contraction K = D on the MXU).
    q = jnp.dot(x, wq, preferred_element_type=jnp.float32)   # (L, hd)
    k = jnp.dot(x, wk, preferred_element_type=jnp.float32)   # (L, hd)
    v = jnp.dot(x, wv, preferred_element_type=jnp.float32)   # (L, hd)

    # Scores without an explicit transpose: contract head_dim of both operands.
    scores = lax.dot_general(q, k, dimension_numbers=(((1,), (1,)), ((), ())),
                             preferred_element_type=jnp.float32)   # (L, L)
    scores = scores * jnp.float32(1.0 / math.sqrt(head_dim)) + kbias_ref[0]

    # Numerically-stable softmax; fold 1/l into the (L, hd) PV result instead
    # of dividing the full (L, L) probability matrix.
    m = jnp.max(scores, axis=-1, keepdims=True)
    p = jnp.exp(scores - m)
    l = jnp.sum(p, axis=-1, keepdims=True)
    pv = jnp.dot(p, v, preferred_element_type=jnp.float32)          # (L, hd)
    # TODO(synk): attention dropout omitted (inference semantics — identity).
    attn_h = pv * pl.reciprocal(l, approx=False)                    # (L, hd)

    # This head's slice of the output projection, accumulated over heads.
    contrib = jnp.dot(attn_h, wo_ref[h],
                      preferred_element_type=jnp.float32)           # (L, D)

    @pl.when(h == 0)
    def _():
        acc_ref[...] = jnp.zeros_like(acc_ref)

    acc_ref[...] += contrib

    @pl.when(h == pl.num_programs(1) - 1)
    def _():
        attn_out = acc_ref[...] + bo_ref[...]                       # + out bias
        y = x.astype(jnp.float32) + attn_out                        # residual
        mu = jnp.mean(y, axis=-1, keepdims=True)
        var = jnp.mean(jnp.square(y - mu), axis=-1, keepdims=True)
        y = (y - mu) * lax.rsqrt(var + eps)
        out_ref[0] = (y * g_ref[...] + beta_ref[...]).astype(out_ref.dtype)


def ffn_layer_kernel(x_ref, w1_ref, b1_ref, w2_ref, b2_ref,
                     g_ref, beta_ref, out_ref, *, eps):
    """Fused FFN + residual + LayerNorm2 for one batch element."""
    x = x_ref[0]                                                    # (L, D)
    hmid = jnp.dot(x, w1_ref[...], preferred_element_type=jnp.float32)
    hmid = jnp.maximum(hmid + b1_ref[...], 0.0)                     # (L, dff)
    f = jnp.dot(hmid, w2_ref[...], preferred_element_type=jnp.float32)
    f = f + b2_ref[...]
    # TODO(synk): FFN dropout omitted (inference semantics — identity).
    y = x.astype(jnp.float32) + f                                   # residual
    mu = jnp.mean(y, axis=-1, keepdims=True)
    var = jnp.mean(jnp.square(y - mu), axis=-1, keepdims=True)
    y = (y - mu) * lax.rsqrt(var + eps)
    out_ref[0] = (y * g_ref[...] + beta_ref[...]).astype(out_ref.dtype)


def layernorm_kernel(x_ref, g_ref, beta_ref, out_ref, *, eps):
    """Final encoder LayerNorm for one batch element."""
    x = x_ref[0].astype(jnp.float32)
    mu = jnp.mean(x, axis=-1, keepdims=True)
    var = jnp.mean(jnp.square(x - mu), axis=-1, keepdims=True)
    y = (x - mu) * lax.rsqrt(var + eps)
    out_ref[0] = (y * g_ref[...] + beta_ref[...]).astype(out_ref.dtype)


# ---------------------------------------------------------------------------
# Wrappers
# ---------------------------------------------------------------------------

def attention_layer(x, kbias, wq_h, wk_h, wv_h, wo_h, bo, gamma, beta, *, eps=1e-5):
    B, L, D = x.shape
    H, _, hd = wq_h.shape
    kernel = functools.partial(attn_layer_kernel, head_dim=hd, eps=eps)
    return pl.pallas_call(
        kernel,
        out_shape=jax.ShapeDtypeStruct((B, L, D), x.dtype),
        grid=(B, H),
        in_specs=[
            pl.BlockSpec((1, L, D), lambda b, h: (b, 0, 0)),    # x (shared q/k/v)
            pl.BlockSpec((1, 1, L), lambda b, h: (b, 0, 0)),    # additive key bias
            pl.BlockSpec((H, D, hd), lambda b, h: (0, 0, 0)),   # wq (resident)
            pl.BlockSpec((H, D, hd), lambda b, h: (0, 0, 0)),   # wk (resident)
            pl.BlockSpec((H, D, hd), lambda b, h: (0, 0, 0)),   # wv (resident)
            pl.BlockSpec((H, hd, D), lambda b, h: (0, 0, 0)),   # wo (resident)
            pl.BlockSpec((1, D), lambda b, h: (0, 0)),          # out-proj bias
            pl.BlockSpec((1, D), lambda b, h: (0, 0)),          # LN1 gamma
            pl.BlockSpec((1, D), lambda b, h: (0, 0)),          # LN1 beta
        ],
        out_specs=pl.BlockSpec((1, L, D), lambda b, h: (b, 0, 0)),
        scratch_shapes=[pltpu.VMEM((L, D), jnp.float32)],
        compiler_params=pltpu.CompilerParams(
            dimension_semantics=("parallel", "arbitrary")),
    )(x, kbias, wq_h, wk_h, wv_h, wo_h,
      bo.reshape(1, D), gamma.reshape(1, D), beta.reshape(1, D))


def ffn_layer(x, w1, b1, w2, b2, gamma, beta, *, eps=1e-5):
    B, L, D = x.shape
    dff = w1.shape[1]
    kernel = functools.partial(ffn_layer_kernel, eps=eps)
    return pl.pallas_call(
        kernel,
        out_shape=jax.ShapeDtypeStruct((B, L, D), x.dtype),
        grid=(B,),
        in_specs=[
            pl.BlockSpec((1, L, D), lambda b: (b, 0, 0)),
            pl.BlockSpec((D, dff), lambda b: (0, 0)),
            pl.BlockSpec((1, dff), lambda b: (0, 0)),
            pl.BlockSpec((dff, D), lambda b: (0, 0)),
            pl.BlockSpec((1, D), lambda b: (0, 0)),
            pl.BlockSpec((1, D), lambda b: (0, 0)),
            pl.BlockSpec((1, D), lambda b: (0, 0)),
        ],
        out_specs=pl.BlockSpec((1, L, D), lambda b: (b, 0, 0)),
        compiler_params=pltpu.CompilerParams(dimension_semantics=("parallel",)),
    )(x, w1, b1.reshape(1, dff), w2, b2.reshape(1, D),
      gamma.reshape(1, D), beta.reshape(1, D))


def layernorm(x, gamma, beta, *, eps=1e-5):
    B, L, D = x.shape
    kernel = functools.partial(layernorm_kernel, eps=eps)
    return pl.pallas_call(
        kernel,
        out_shape=jax.ShapeDtypeStruct((B, L, D), x.dtype),
        grid=(B,),
        in_specs=[
            pl.BlockSpec((1, L, D), lambda b: (b, 0, 0)),
            pl.BlockSpec((1, D), lambda b: (0, 0)),
            pl.BlockSpec((1, D), lambda b: (0, 0)),
        ],
        out_specs=pl.BlockSpec((1, L, D), lambda b: (b, 0, 0)),
        compiler_params=pltpu.CompilerParams(dimension_semantics=("parallel",)),
    )(x, gamma.reshape(1, D), beta.reshape(1, D))


def encoder_forward(src, src_mask, params, *, num_heads):
    """Full Encoder forward (eval): embed + PE -> N layers -> final LayerNorm."""
    B, L = src.shape
    emb = params["emb"]
    D = emb.shape[1]
    H = num_heads
    hd = D // H

    # Embedding lookup + sinusoidal positional encoding.
    # TODO(synk): token-id embedding gather is left to XLA (data-dependent
    # gather); everything downstream runs in Pallas kernels.
    x = (emb[src] + params["pe"][:L][None, :, :]).astype(jnp.float32)

    # Compact additive key bias replaces the O(Lq*Lk) int mask:
    # (B, 1, L) float32, 0 where visible, -10000 where masked.
    key_mask = src_mask.reshape(B, L)
    kbias = jnp.where(key_mask == 0, -10000.0, 0.0).astype(jnp.float32)
    kbias = kbias.reshape(B, 1, L)

    for lp in params["layers"]:
        # Pre-split projection weights per head (host-side layout plumbing).
        wq_h = lp["wq"].reshape(D, H, hd).transpose(1, 0, 2)   # (H, D, hd)
        wk_h = lp["wk"].reshape(D, H, hd).transpose(1, 0, 2)
        wv_h = lp["wv"].reshape(D, H, hd).transpose(1, 0, 2)
        wo_h = lp["wo"].reshape(H, hd, D)                       # (H, hd, D)
        x = attention_layer(x, kbias, wq_h, wk_h, wv_h, wo_h,
                            lp["bo"], lp["ln1_g"], lp["ln1_b"])
        x = ffn_layer(x, lp["w1"], lp["b1"], lp["w2"], lp["b2"],
                      lp["ln2_g"], lp["ln2_b"])

    return layernorm(x, params["lnf_g"], params["lnf_b"])


# ---------------------------------------------------------------------------
# Parameters and plain-JAX reference (mirrors the PyTorch forward, eval mode)
# ---------------------------------------------------------------------------

def sinusoidal_pe(max_len, d_model):
    pos = jnp.arange(max_len, dtype=jnp.float32)[:, None]
    div = jnp.exp(jnp.arange(0, d_model, 2, dtype=jnp.float32)
                  * (-math.log(10000.0) / d_model))
    pe = jnp.zeros((max_len, d_model), jnp.float32)
    pe = pe.at[:, 0::2].set(jnp.sin(pos * div))
    pe = pe.at[:, 1::2].set(jnp.cos(pos * div))
    return pe


def init_params(key, vocab_size, d_model, num_layers, d_ff, max_len=64):
    n_per_layer = 9
    keys = jax.random.split(key, 1 + num_layers * n_per_layer)
    emb = jax.random.normal(keys[0], (vocab_size, d_model), jnp.float32)
    emb = emb.at[0].set(0.0)                      # padding_idx = 0
    b_in = 1.0 / math.sqrt(d_model)
    b_ff = 1.0 / math.sqrt(d_ff)

    layers = []
    idx = 1
    for _ in range(num_layers):
        k = keys[idx:idx + n_per_layer]
        idx += n_per_layer
        layers.append(dict(
            wq=jax.random.uniform(k[0], (d_model, d_model), jnp.float32, -b_in, b_in),
            wk=jax.random.uniform(k[1], (d_model, d_model), jnp.float32, -b_in, b_in),
            wv=jax.random.uniform(k[2], (d_model, d_model), jnp.float32, -b_in, b_in),
            wo=jax.random.uniform(k[3], (d_model, d_model), jnp.float32, -b_in, b_in),
            bo=jax.random.uniform(k[4], (d_model,), jnp.float32, -b_in, b_in),
            w1=jax.random.uniform(k[5], (d_model, d_ff), jnp.float32, -b_in, b_in),
            b1=jax.random.uniform(k[6], (d_ff,), jnp.float32, -b_in, b_in),
            w2=jax.random.uniform(k[7], (d_ff, d_model), jnp.float32, -b_ff, b_ff),
            b2=jax.random.uniform(k[8], (d_model,), jnp.float32, -b_ff, b_ff),
            ln1_g=jnp.ones((d_model,), jnp.float32),
            ln1_b=jnp.zeros((d_model,), jnp.float32),
            ln2_g=jnp.ones((d_model,), jnp.float32),
            ln2_b=jnp.zeros((d_model,), jnp.float32),
        ))
    return dict(emb=emb, pe=sinusoidal_pe(max_len, d_model), layers=layers,
                lnf_g=jnp.ones((d_model,), jnp.float32),
                lnf_b=jnp.zeros((d_model,), jnp.float32))


def _ln_ref(x, g, b, eps=1e-5):
    mu = jnp.mean(x, axis=-1, keepdims=True)
    var = jnp.mean(jnp.square(x - mu), axis=-1, keepdims=True)
    return (x - mu) / jnp.sqrt(var + eps) * g + b


def reference_encoder(src, src_mask, params, num_heads):
    x = params["emb"][src] + params["pe"][: src.shape[1]][None]
    H = num_heads
    for lp in params["layers"]:
        B, L, D = x.shape
        hd = D // H
        q = (x @ lp["wq"]).reshape(B, L, H, hd).transpose(0, 2, 1, 3)
        k = (x @ lp["wk"]).reshape(B, L, H, hd).transpose(0, 2, 1, 3)
        v = (x @ lp["wv"]).reshape(B, L, H, hd).transpose(0, 2, 1, 3)
        s = jnp.einsum("bhqd,bhkd->bhqk", q, k) / math.sqrt(hd)
        s = jnp.where(src_mask == 0, -10000.0, s)
        p = jax.nn.softmax(s, axis=-1)
        a = jnp.einsum("bhqk,bhkd->bhqd", p, v).transpose(0, 2, 1, 3).reshape(B, L, D)
        a = a @ lp["wo"] + lp["bo"]
        x = _ln_ref(x + a, lp["ln1_g"], lp["ln1_b"])
        f = jnp.maximum(x @ lp["w1"] + lp["b1"], 0.0) @ lp["w2"] + lp["b2"]
        x = _ln_ref(x + f, lp["ln2_g"], lp["ln2_b"])
    return _ln_ref(x, params["lnf_g"], params["lnf_b"])


# ---------------------------------------------------------------------------

if __name__ == "__main__":
    jax.config.update("jax_default_matmul_precision", "highest")

    B, L, D, H = 2, 8, 32, 4
    DFF, VOCAB, NLAYERS = 64, 50, 2

    key = jax.random.PRNGKey(0)
    kp, ks = jax.random.split(key)
    params = init_params(kp, VOCAB, D, NLAYERS, DFF, max_len=64)

    # Token ids with some right padding (id 0) and the matching padding mask.
    src = jax.random.randint(ks, (B, L), 1, VOCAB, dtype=jnp.int32)
    lengths = jnp.array([L, 5], dtype=jnp.int32)
    valid = (jnp.arange(L, dtype=jnp.int32)[None, :] < lengths[:, None])
    src = jnp.where(valid, src, 0).astype(jnp.int32)
    src_mask = valid.astype(jnp.int32).reshape(B, 1, 1, L)   # 1 visible, 0 masked

    fwd = jax.jit(functools.partial(encoder_forward, num_heads=H))
    out = fwd(src, src_mask, params)
    out = jax.block_until_ready(out)

    ref = reference_encoder(src, src_mask, params, H)
    assert out.shape == (B, L, D)
    assert jnp.allclose(out, ref, atol=5e-4, rtol=5e-4), "mismatch vs reference"

    print("KERNEL_OK")
</pallas_src>

<mosaic_0001>
module attributes {stable_mosaic.version = 11 : i64} {
  func.func @layernorm_kernel(%arg0: i32, %arg1: memref<1x8x32xf32, #tpu.memory_space<vmem>>, %arg2: memref<1x32xf32, #tpu.memory_space<vmem>>, %arg3: memref<1x32xf32, #tpu.memory_space<vmem>>, %arg4: memref<1x8x32xf32, #tpu.memory_space<vmem>>) attributes {dimension_semantics = [#tpu.dimension_semantics<parallel>], iteration_bounds = array<i64: 2>, scalar_prefetch = 0 : i64, scratch_operands = 0 : i64, tpu.core_type = #tpu.core_type<tc>, window_params = [{transform_indices = @transform_0, window_bounds = array<i64: 1, 8, 32>}, {pipeline_mode = #tpu.pipeline_mode<synchronous>, transform_indices = @transform_1, window_bounds = array<i64: 1, 32>}, {pipeline_mode = #tpu.pipeline_mode<synchronous>, transform_indices = @transform_2, window_bounds = array<i64: 1, 32>}, {transform_indices = @transform_3, window_bounds = array<i64: 1, 8, 32>}]} {
    %c0 = arith.constant 0 : index
    %c0_0 = arith.constant 0 : index
    %c0_1 = arith.constant 0 : index
    %0 = vector.load %arg1[%c0, %c0_0, %c0_1] : memref<1x8x32xf32, #tpu.memory_space<vmem>>, vector<1x8x32xf32>
    %1 = vector.shape_cast %0 : vector<1x8x32xf32> to vector<8x32xf32>
    %cst = arith.constant dense<0.000000e+00> : vector<8xf32>
    %2 = vector.multi_reduction <add>, %1, %cst [1] : vector<8x32xf32> to vector<8xf32>
    %3 = vector.shape_cast %2 : vector<8xf32> to vector<8x1xf32>
    %cst_2 = arith.constant 3.200000e+01 : f32
    %4 = vector.broadcast %cst_2 : f32 to vector<8x1xf32>
    %5 = arith.divf %3, %4 : vector<8x1xf32>
    %6 = vector.broadcast %5 : vector<8x1xf32> to vector<8x32xf32>
    %7 = arith.subf %1, %6 : vector<8x32xf32>
    %8 = arith.mulf %7, %7 : vector<8x32xf32>
    %cst_3 = arith.constant dense<0.000000e+00> : vector<8xf32>
    %9 = vector.multi_reduction <add>, %8, %cst_3 [1] : vector<8x32xf32> to vector<8xf32>
    %10 = vector.shape_cast %9 : vector<8xf32> to vector<8x1xf32>
    %cst_4 = arith.constant 3.200000e+01 : f32
    %11 = vector.broadcast %cst_4 : f32 to vector<8x1xf32>
    %12 = arith.divf %10, %11 : vector<8x1xf32>
    %13 = vector.broadcast %5 : vector<8x1xf32> to vector<8x32xf32>
    %14 = arith.subf %1, %13 : vector<8x32xf32>
    %cst_5 = arith.constant 9.99999974E-6 : f32
    %15 = vector.broadcast %cst_5 : f32 to vector<8x1xf32>
    %16 = arith.addf %12, %15 : vector<8x1xf32>
    %17 = math.rsqrt %16 : vector<8x1xf32>
    %18 = vector.broadcast %17 : vector<8x1xf32> to vector<8x32xf32>
    %19 = arith.mulf %14, %18 : vector<8x32xf32>
    %c0_6 = arith.constant 0 : index
    %c0_7 = arith.constant 0 : index
    %20 = vector.load %arg2[%c0_6, %c0_7] : memref<1x32xf32, #tpu.memory_space<vmem>>, vector<1x32xf32>
    %21 = vector.broadcast %20 : vector<1x32xf32> to vector<8x32xf32>
    %22 = arith.mulf %19, %21 : vector<8x32xf32>
    %c0_8 = arith.constant 0 : index
    %c0_9 = arith.constant 0 : index
    %23 = vector.load %arg3[%c0_8, %c0_9] : memref<1x32xf32, #tpu.memory_space<vmem>>, vector<1x32xf32>
    %24 = vector.broadcast %23 : vector<1x32xf32> to vector<8x32xf32>
    %25 = arith.addf %22, %24 : vector<8x32xf32>
    %c0_10 = arith.constant 0 : index
    %c0_11 = arith.constant 0 : index
    %c0_12 = arith.constant 0 : index
    %26 = vector.load %arg4[%c0_10, %c0_11, %c0_12] : memref<1x8x32xf32, #tpu.memory_space<vmem>>, vector<1x8x32xf32>
    %27 = vector.shape_cast %26 : vector<1x8x32xf32> to vector<8x32xf32>
    %28 = vector.shape_cast %25 : vector<8x32xf32> to vector<1x8x32xf32>
    tpu.vector_store %arg4[%c0_10, %c0_11, %c0_12], %28 {strides = array<i32>} : memref<1x8x32xf32, #tpu.memory_space<vmem>>, vector<1x8x32xf32>,
    return
  }
  func.func @transform_0(%arg0: i32) -> (i32, i32, i32) {
    %c0_i32 = arith.constant 0 : i32
    %c0_i32_0 = arith.constant 0 : i32
    %c0_i32_1 = arith.constant 0 : i32
    return %arg0, %c0_i32, %c0_i32_0 : i32, i32, i32
  }
  func.func @transform_1(%arg0: i32) -> (i32, i32) {
    %c0_i32 = arith.constant 0 : i32
    %c0_i32_0 = arith.constant 0 : i32
    %c0_i32_1 = arith.constant 0 : i32
    return %c0_i32, %c0_i32_0 : i32, i32
  }
  func.func @transform_2(%arg0: i32) -> (i32, i32) {
    %c0_i32 = arith.constant 0 : i32
    %c0_i32_0 = arith.constant 0 : i32
    %c0_i32_1 = arith.constant 0 : i32
    return %c0_i32, %c0_i32_0 : i32, i32
  }
  func.func @transform_3(%arg0: i32) -> (i32, i32, i32) {
    %c0_i32 = arith.constant 0 : i32
    %c0_i32_0 = arith.constant 0 : i32
    %c0_i32_1 = arith.constant 0 : i32
    return %arg0, %c0_i32, %c0_i32_0 : i32, i32, i32
  }
}

module attributes {stable_mosaic.version = 11 : i64} {
  func.func @ffn_layer_kernel(%arg0: i32, %arg1: memref<1x8x32xf32, #tpu.memory_space<vmem>>, %arg2: memref<32x64xf32, #tpu.memory_space<vmem>>, %arg3: memref<1x64xf32, #tpu.memory_space<vmem>>, %arg4: memref<64x32xf32, #tpu.memory_space<vmem>>, %arg5: memref<1x32xf32, #tpu.memory_space<vmem>>, %arg6: memref<1x32xf32, #tpu.memory_space<vmem>>, %arg7: memref<1x32xf32, #tpu.memory_space<vmem>>, %arg8: memref<1x8x32xf32, #tpu.memory_space<vmem>>) attributes {dimension_semantics = [#tpu.dimension_semantics<parallel>], iteration_bounds = array<i64: 2>, scalar_prefetch = 0 : i64, scratch_operands = 0 : i64, tpu.core_type = #tpu.core_type<tc>, window_params = [{transform_indices = @transform_0, window_bounds = array<i64: 1, 8, 32>}, {pipeline_mode = #tpu.pipeline_mode<synchronous>, transform_indices = @transform_1, window_bounds = array<i64: 32, 64>}, {pipeline_mode = #tpu.pipeline_mode<synchronous>, transform_indices = @transform_2, window_bounds = array<i64: 1, 64>}, {pipeline_mode = #tpu.pipeline_mode<synchronous>, transform_indices = @transform_3, window_bounds = array<i64: 64, 32>}, {pipeline_mode = #tpu.pipeline_mode<synchronous>, transform_indices = @transform_4, window_bounds = array<i64: 1, 32>}, {pipeline_mode = #tpu.pipeline_mode<synchronous>, transform_indices = @transform_5, window_bounds = array<i64: 1, 32>}, {pipeline_mode = #tpu.pipeline_mode<synchronous>, transform_indices = @transform_6, window_bounds = array<i64: 1, 32>}, {transform_indices = @transform_7, window_bounds = array<i64: 1, 8, 32>}]} {
    %c0 = arith.constant 0 : index
    %c0_0 = arith.constant 0 : index
    %c0_1 = arith.constant 0 : index
    %0 = vector.load %arg1[%c0, %c0_0, %c0_1] : memref<1x8x32xf32, #tpu.memory_space<vmem>>, vector<1x8x32xf32>
    %1 = vector.shape_cast %0 : vector<1x8x32xf32> to vector<8x32xf32>
    %c0_2 = arith.constant 0 : index
    %c0_3 = arith.constant 0 : index
    %2 = vector.load %arg2[%c0_2, %c0_3] : memref<32x64xf32, #tpu.memory_space<vmem>>, vector<32x64xf32>
    %cst = arith.constant dense<0.000000e+00> : vector<8x64xf32>
    %3 = tpu.matmul %1, %2, %cst {dimension_numbers = #tpu.dot_dimension_numbers<[1], [0], [0], [1], [0, 0, 1, 1], [], []>, precision = #tpu.contract_precision<fp32>} : vector<8x32xf32>, vector<32x64xf32>, vector<8x64xf32> -> vector<8x64xf32>
    %c0_4 = arith.constant 0 : index
    %c0_5 = arith.constant 0 : index
    %4 = vector.load %arg3[%c0_4, %c0_5] : memref<1x64xf32, #tpu.memory_space<vmem>>, vector<1x64xf32>
    %5 = vector.broadcast %4 : vector<1x64xf32> to vector<8x64xf32>
    %6 = arith.addf %3, %5 : vector<8x64xf32>
    %cst_6 = arith.constant 0.000000e+00 : f32
    %7 = vector.broadcast %cst_6 : f32 to vector<8x64xf32>
    %8 = arith.maximumf %6, %7 : vector<8x64xf32>
    %c0_7 = arith.constant 0 : index
    %c0_8 = arith.constant 0 : index
    %9 = vector.load %arg4[%c0_7, %c0_8] : memref<64x32xf32, #tpu.memory_space<vmem>>, vector<64x32xf32>
    %cst_9 = arith.constant dense<0.000000e+00> : vector<8x32xf32>
    %10 = tpu.matmul %8, %9, %cst_9 {dimension_numbers = #tpu.dot_dimension_numbers<[1], [0], [0], [1], [0, 0, 1, 1], [], []>, precision = #tpu.contract_precision<fp32>} : vector<8x64xf32>, vector<64x32xf32>, vector<8x32xf32> -> vector<8x32xf32>
    %c0_10 = arith.constant 0 : index
    %c0_11 = arith.constant 0 : index
    %11 = vector.load %arg5[%c0_10, %c0_11] : memref<1x32xf32, #tpu.memory_space<vmem>>, vector<1x32xf32>
    %12 = vector.broadcast %11 : vector<1x32xf32> to vector<8x32xf32>
    %13 = arith.addf %10, %12 : vector<8x32xf32>
    %14 = arith.addf %1, %13 : vector<8x32xf32>
    %cst_12 = arith.constant dense<0.000000e+00> : vector<8xf32>
    %15 = vector.multi_reduction <add>, %14, %cst_12 [1] : vector<8x32xf32> to vector<8xf32>
    %16 = vector.shape_cast %15 : vector<8xf32> to vector<8x1xf32>
    %cst_13 = arith.constant 3.200000e+01 : f32
    %17 = vector.broadcast %cst_13 : f32 to vector<8x1xf32>
    %18 = arith.divf %16, %17 : vector<8x1xf32>
    %19 = vector.broadcast %18 : vector<8x1xf32> to vector<8x32xf32>
    %20 = arith.subf %14, %19 : vector<8x32xf32>
    %21 = arith.mulf %20, %20 : vector<8x32xf32>
    %cst_14 = arith.constant dense<0.000000e+00> : vector<8xf32>
    %22 = vector.multi_reduction <add>, %21, %cst_14 [1] : vector<8x32xf32> to vector<8xf32>
    %23 = vector.shape_cast %22 : vector<8xf32> to vector<8x1xf32>
    %cst_15 = arith.constant 3.200000e+01 : f32
    %24 = vector.broadcast %cst_15 : f32 to vector<8x1xf32>
    %25 = arith.divf %23, %24 : vector<8x1xf32>
    %26 = vector.broadcast %18 : vector<8x1xf32> to vector<8x32xf32>
    %27 = arith.subf %14, %26 : vector<8x32xf32>
    %cst_16 = arith.constant 9.99999974E-6 : f32
    %28 = vector.broadcast %cst_16 : f32 to vector<8x1xf32>
    %29 = arith.addf %25, %28 : vector<8x1xf32>
    %30 = math.rsqrt %29 : vector<8x1xf32>
    %31 = vector.broadcast %30 : vector<8x1xf32> to vector<8x32xf32>
    %32 = arith.mulf %27, %31 : vector<8x32xf32>
    %c0_17 = arith.constant 0 : index
    %c0_18 = arith.constant 0 : index
    %33 = vector.load %arg6[%c0_17, %c0_18] : memref<1x32xf32, #tpu.memory_space<vmem>>, vector<1x32xf32>
    %34 = vector.broadcast %33 : vector<1x32xf32> to vector<8x32xf32>
    %35 = arith.mulf %32, %34 : vector<8x32xf32>
    %c0_19 = arith.constant 0 : index
    %c0_20 = arith.constant 0 : index
    %36 = vector.load %arg7[%c0_19, %c0_20] : memref<1x32xf32, #tpu.memory_space<vmem>>, vector<1x32xf32>
    %37 = vector.broadcast %36 : vector<1x32xf32> to vector<8x32xf32>
    %38 = arith.addf %35, %37 : vector<8x32xf32>
    %c0_21 = arith.constant 0 : index
    %c0_22 = arith.constant 0 : index
    %c0_23 = arith.constant 0 : index
    %39 = vector.load %arg8[%c0_21, %c0_22, %c0_23] : memref<1x8x32xf32, #tpu.memory_space<vmem>>, vector<1x8x32xf32>
    %40 = vector.shape_cast %39 : vector<1x8x32xf32> to vector<8x32xf32>
    %41 = vector.shape_cast %38 : vector<8x32xf32> to vector<1x8x32xf32>
    tpu.vector_store %arg8[%c0_21, %c0_22, %c0_23], %41 {strides = array<i32>} : memref<1x8x32xf32, #tpu.memory_space<vmem>>, vector<1x8x32xf32>,
    return
  }
  func.func @transform_0(%arg0: i32) -> (i32, i32, i32) {
    %c0_i32 = arith.constant 0 : i32
    %c0_i32_0 = arith.constant 0 : i32
    %c0_i32_1 = arith.constant 0 : i32
    return %arg0, %c0_i32, %c0_i32_0 : i32, i32, i32
  }
  func.func @transform_1(%arg0: i32) -> (i32, i32) {
    %c0_i32 = arith.constant 0 : i32
    %c0_i32_0 = arith.constant 0 : i32
    %c0_i32_1 = arith.constant 0 : i32
    return %c0_i32, %c0_i32_0 : i32, i32
  }
  func.func @transform_2(%arg0: i32) -> (i32, i32) {
    %c0_i32 = arith.constant 0 : i32
    %c0_i32_0 = arith.constant 0 : i32
    %c0_i32_1 = arith.constant 0 : i32
    return %c0_i32, %c0_i32_0 : i32, i32
  }
  func.func @transform_3(%arg0: i32) -> (i32, i32) {
    %c0_i32 = arith.constant 0 : i32
    %c0_i32_0 = arith.constant 0 : i32
    %c0_i32_1 = arith.constant 0 : i32
    return %c0_i32, %c0_i32_0 : i32, i32
  }
  func.func @transform_4(%arg0: i32) -> (i32, i32) {
    %c0_i32 = arith.constant 0 : i32
    %c0_i32_0 = arith.constant 0 : i32
    %c0_i32_1 = arith.constant 0 : i32
    return %c0_i32, %c0_i32_0 : i32, i32
  }
  func.func @transform_5(%arg0: i32) -> (i32, i32) {
    %c0_i32 = arith.constant 0 : i32
    %c0_i32_0 = arith.constant 0 : i32
    %c0_i32_1 = arith.constant 0 : i32
    return %c0_i32, %c0_i32_0 : i32, i32
  }
  func.func @transform_6(%arg0: i32) -> (i32, i32) {
    %c0_i32 = arith.constant 0 : i32
    %c0_i32_0 = arith.constant 0 : i32
    %c0_i32_1 = arith.constant 0 : i32
    return %c0_i32, %c0_i32_0 : i32, i32
  }
  func.func @transform_7(%arg0: i32) -> (i32, i32, i32) {
    %c0_i32 = arith.constant 0 : i32
    %c0_i32_0 = arith.constant 0 : i32
    %c0_i32_1 = arith.constant 0 : i32
    return %arg0, %c0_i32, %c0_i32_0 : i32, i32, i32
  }
}

module attributes {stable_mosaic.version = 11 : i64} {
  func.func @attn_layer_kernel(%arg0: i32, %arg1: i32, %arg2: memref<1x8x32xf32, #tpu.memory_space<vmem>>, %arg3: memref<1x1x8xf32, #tpu.memory_space<vmem>>, %arg4: memref<4x32x8xf32, #tpu.memory_space<vmem>>, %arg5: memref<4x32x8xf32, #tpu.memory_space<vmem>>, %arg6: memref<4x32x8xf32, #tpu.memory_space<vmem>>, %arg7: memref<4x8x32xf32, #tpu.memory_space<vmem>>, %arg8: memref<1x32xf32, #tpu.memory_space<vmem>>, %arg9: memref<1x32xf32, #tpu.memory_space<vmem>>, %arg10: memref<1x32xf32, #tpu.memory_space<vmem>>, %arg11: memref<1x8x32xf32, #tpu.memory_space<vmem>>, %arg12: memref<8x32xf32, #tpu.memory_space<vmem>>) attributes {dimension_semantics = [#tpu.dimension_semantics<parallel>, #tpu.dimension_semantics<arbitrary>], iteration_bounds = array<i64: 2, 4>, scalar_prefetch = 0 : i64, scratch_operands = 1 : i64, tpu.core_type = #tpu.core_type<tc>, window_params = [{transform_indices = @transform_0, window_bounds = array<i64: 1, 8, 32>}, {transform_indices = @transform_1, window_bounds = array<i64: 1, 1, 8>}, {pipeline_mode = #tpu.pipeline_mode<synchronous>, transform_indices = @transform_2, window_bounds = array<i64: 4, 32, 8>}, {pipeline_mode = #tpu.pipeline_mode<synchronous>, transform_indices = @transform_3, window_bounds = array<i64: 4, 32, 8>}, {pipeline_mode = #tpu.pipeline_mode<synchronous>, transform_indices = @transform_4, window_bounds = array<i64: 4, 32, 8>}, {pipeline_mode = #tpu.pipeline_mode<synchronous>, transform_indices = @transform_5, window_bounds = array<i64: 4, 8, 32>}, {pipeline_mode = #tpu.pipeline_mode<synchronous>, transform_indices = @transform_6, window_bounds = array<i64: 1, 32>}, {pipeline_mode = #tpu.pipeline_mode<synchronous>, transform_indices = @transform_7, window_bounds = array<i64: 1, 32>}, {pipeline_mode = #tpu.pipeline_mode<synchronous>, transform_indices = @transform_8, window_bounds = array<i64: 1, 32>}, {transform_indices = @transform_9, window_bounds = array<i64: 1, 8, 32>}]} {
    %c0 = arith.constant 0 : index
    %c0_0 = arith.constant 0 : index
    %c0_1 = arith.constant 0 : index
    %0 = vector.load %arg2[%c0, %c0_0, %c0_1] : memref<1x8x32xf32, #tpu.memory_space<vmem>>, vector<1x8x32xf32>
    %1 = vector.shape_cast %0 : vector<1x8x32xf32> to vector<8x32xf32>
    %2 = arith.index_cast %arg1 : i32 to index
    %c0_2 = arith.constant 0 : index
    %c0_3 = arith.constant 0 : index
    %3 = vector.load %arg4[%2, %c0_2, %c0_3] : memref<4x32x8xf32, #tpu.memory_space<vmem>>, vector<1x32x8xf32>
    %4 = vector.shape_cast %3 : vector<1x32x8xf32> to vector<32x8xf32>
    %5 = arith.index_cast %arg1 : i32 to index
    %c0_4 = arith.constant 0 : index
    %c0_5 = arith.constant 0 : index
    %6 = vector.load %arg5[%5, %c0_4, %c0_5] : memref<4x32x8xf32, #tpu.memory_space<vmem>>, vector<1x32x8xf32>
    %7 = vector.shape_cast %6 : vector<1x32x8xf32> to vector<32x8xf32>
    %8 = arith.index_cast %arg1 : i32 to index
    %c0_6 = arith.constant 0 : index
    %c0_7 = arith.constant 0 : index
    %9 = vector.load %arg6[%8, %c0_6, %c0_7] : memref<4x32x8xf32, #tpu.memory_space<vmem>>, vector<1x32x8xf32>
    %10 = vector.shape_cast %9 : vector<1x32x8xf32> to vector<32x8xf32>
    %cst = arith.constant dense<0.000000e+00> : vector<8x8xf32>
    %11 = tpu.matmul %1, %4, %cst {dimension_numbers = #tpu.dot_dimension_numbers<[1], [0], [0], [1], [0, 0, 1, 1], [], []>, precision = #tpu.contract_precision<fp32>} : vector<8x32xf32>, vector<32x8xf32>, vector<8x8xf32> -> vector<8x8xf32>
    %cst_8 = arith.constant dense<0.000000e+00> : vector<8x8xf32>
    %12 = tpu.matmul %1, %7, %cst_8 {dimension_numbers = #tpu.dot_dimension_numbers<[1], [0], [0], [1], [0, 0, 1, 1], [], []>, precision = #tpu.contract_precision<fp32>} : vector<8x32xf32>, vector<32x8xf32>, vector<8x8xf32> -> vector<8x8xf32>
    %cst_9 = arith.constant dense<0.000000e+00> : vector<8x8xf32>
    %13 = tpu.matmul %1, %10, %cst_9 {dimension_numbers = #tpu.dot_dimension_numbers<[1], [0], [0], [1], [0, 0, 1, 1], [], []>, precision = #tpu.contract_precision<fp32>} : vector<8x32xf32>, vector<32x8xf32>, vector<8x8xf32> -> vector<8x8xf32>
    %cst_10 = arith.constant dense<0.000000e+00> : vector<8x8xf32>
    %14 = tpu.matmul %11, %12, %cst_10 {dimension_numbers = #tpu.dot_dimension_numbers<[1], [1], [0], [0], [0, 0, 1, 0], [], []>, precision = #tpu.contract_precision<fp32>} : vector<8x8xf32>, vector<8x8xf32>, vector<8x8xf32> -> vector<8x8xf32>
    %cst_11 = arith.constant 0.353553385 : f32
    %15 = vector.broadcast %cst_11 : f32 to vector<8x8xf32>
    %16 = arith.mulf %14, %15 : vector<8x8xf32>
    %c0_12 = arith.constant 0 : index
    %c0_13 = arith.constant 0 : index
    %c0_14 = arith.constant 0 : index
    %17 = vector.load %arg3[%c0_12, %c0_13, %c0_14] : memref<1x1x8xf32, #tpu.memory_space<vmem>>, vector<1x1x8xf32>
    %18 = vector.shape_cast %17 : vector<1x1x8xf32> to vector<1x8xf32>
    %19 = vector.broadcast %18 : vector<1x8xf32> to vector<8x8xf32>
    %20 = arith.addf %16, %19 : vector<8x8xf32>
    %cst_15 = arith.constant dense<0xFF800000> : vector<8xf32>
    %21 = vector.multi_reduction <maximumf>, %20, %cst_15 [1] : vector<8x8xf32> to vector<8xf32>
    %22 = vector.shape_cast %21 : vector<8xf32> to vector<8x1xf32>
    %23 = vector.broadcast %22 : vector<8x1xf32> to vector<8x8xf32>
    %24 = arith.subf %20, %23 : vector<8x8xf32>
    %25 = math.exp %24 : vector<8x8xf32>
    %cst_16 = arith.constant dense<0.000000e+00> : vector<8xf32>
    %26 = vector.multi_reduction <add>, %25, %cst_16 [1] : vector<8x8xf32> to vector<8xf32>
    %27 = vector.shape_cast %26 : vector<8xf32> to vector<8x1xf32>
    %cst_17 = arith.constant dense<0.000000e+00> : vector<8x8xf32>
    %28 = tpu.matmul %25, %13, %cst_17 {dimension_numbers = #tpu.dot_dimension_numbers<[1], [0], [0], [1], [0, 0, 1, 1], [], []>, precision = #tpu.contract_precision<fp32>} : vector<8x8xf32>, vector<8x8xf32>, vector<8x8xf32> -> vector<8x8xf32>
    %29 = tpu.reciprocal %27 : vector<8x1xf32> -> vector<8x1xf32>
    %30 = vector.broadcast %29 : vector<8x1xf32> to vector<8x8xf32>
    %31 = arith.mulf %28, %30 : vector<8x8xf32>
    %32 = arith.index_cast %arg1 : i32 to index
    %c0_18 = arith.constant 0 : index
    %c0_19 = arith.constant 0 : index
    %33 = vector.load %arg7[%32, %c0_18, %c0_19] : memref<4x8x32xf32, #tpu.memory_space<vmem>>, vector<1x8x32xf32>
    %34 = vector.shape_cast %33 : vector<1x8x32xf32> to vector<8x32xf32>
    %cst_20 = arith.constant dense<0.000000e+00> : vector<8x32xf32>
    %35 = tpu.matmul %31, %34, %cst_20 {dimension_numbers = #tpu.dot_dimension_numbers<[1], [0], [0], [1], [0, 0, 1, 1], [], []>, precision = #tpu.contract_precision<fp32>} : vector<8x8xf32>, vector<8x32xf32>, vector<8x32xf32> -> vector<8x32xf32>
    %c0_i32 = arith.constant 0 : i32
    %36 = arith.cmpi eq, %arg1, %c0_i32 : i32
    %37 = arith.extui %36 : i1 to i32
    %c0_i32_21 = arith.constant 0 : i32
    %38 = arith.cmpi ne, %37, %c0_i32_21 : i32
    scf.if %38 {
      %cst_27 = arith.constant 0.000000e+00 : f32
      %45 = vector.broadcast %cst_27 : f32 to vector<8x32xf32>
      %c0_28 = arith.constant 0 : index
      %c0_29 = arith.constant 0 : index
      %46 = vector.load %arg12[%c0_28, %c0_29] : memref<8x32xf32, #tpu.memory_space<vmem>>, vector<8x32xf32>
      tpu.vector_store %arg12[%c0_28, %c0_29], %45 {strides = array<i32>} : memref<8x32xf32, #tpu.memory_space<vmem>>, vector<8x32xf32>,
    } else {
    }
    %c0_22 = arith.constant 0 : index
    %c0_23 = arith.constant 0 : index
    %39 = vector.load %arg12[%c0_22, %c0_23] : memref<8x32xf32, #tpu.memory_space<vmem>>, vector<8x32xf32>
    %40 = arith.addf %39, %35 : vector<8x32xf32>
    %c0_24 = arith.constant 0 : index
    %c0_25 = arith.constant 0 : index
    %41 = vector.load %arg12[%c0_24, %c0_25] : memref<8x32xf32, #tpu.memory_space<vmem>>, vector<8x32xf32>
    tpu.vector_store %arg12[%c0_24, %c0_25], %40 {strides = array<i32>} : memref<8x32xf32, #tpu.memory_space<vmem>>, vector<8x32xf32>,
    %c3_i32 = arith.constant 3 : i32
    %42 = arith.cmpi eq, %arg1, %c3_i32 : i32
    %43 = arith.extui %42 : i1 to i32
    %c0_i32_26 = arith.constant 0 : i32
    %44 = arith.cmpi ne, %43, %c0_i32_26 : i32
    scf.if %44 {
      %c0_27 = arith.constant 0 : index
      %c0_28 = arith.constant 0 : index
      %45 = vector.load %arg12[%c0_27, %c0_28] : memref<8x32xf32, #tpu.memory_space<vmem>>, vector<8x32xf32>
      %c0_29 = arith.constant 0 : index
      %c0_30 = arith.constant 0 : index
      %46 = vector.load %arg8[%c0_29, %c0_30] : memref<1x32xf32, #tpu.memory_space<vmem>>, vector<1x32xf32>
      %47 = vector.broadcast %46 : vector<1x32xf32> to vector<8x32xf32>
      %48 = arith.addf %45, %47 : vector<8x32xf32>
      %49 = arith.addf %1, %48 : vector<8x32xf32>
      %cst_31 = arith.constant dense<0.000000e+00> : vector<8xf32>
      %50 = vector.multi_reduction <add>, %49, %cst_31 [1] : vector<8x32xf32> to vector<8xf32>
      %51 = vector.shape_cast %50 : vector<8xf32> to vector<8x1xf32>
      %cst_32 = arith.constant 3.200000e+01 : f32
      %52 = vector.broadcast %cst_32 : f32 to vector<8x1xf32>
      %53 = arith.divf %51, %52 : vector<8x1xf32>
      %54 = vector.broadcast %53 : vector<8x1xf32> to vector<8x32xf32>
      %55 = arith.subf %49, %54 : vector<8x32xf32>
      %56 = arith.mulf %55, %55 : vector<8x32xf32>
      %cst_33 = arith.constant dense<0.000000e+00> : vector<8xf32>
      %57 = vector.multi_reduction <add>, %56, %cst_33 [1] : vector<8x32xf32> to vector<8xf32>
      %58 = vector.shape_cast %57 : vector<8xf32> to vector<8x1xf32>
      %cst_34 = arith.constant 3.200000e+01 : f32
      %59 = vector.broadcast %cst_34 : f32 to vector<8x1xf32>
      %60 = arith.divf %58, %59 : vector<8x1xf32>
      %61 = vector.broadcast %53 : vector<8x1xf32> to vector<8x32xf32>
      %62 = arith.subf %49, %61 : vector<8x32xf32>
      %cst_35 = arith.constant 9.99999974E-6 : f32
      %63 = vector.broadcast %cst_35 : f32 to vector<8x1xf32>
      %64 = arith.addf %60, %63 : vector<8x1xf32>
      %65 = math.rsqrt %64 : vector<8x1xf32>
      %66 = vector.broadcast %65 : vector<8x1xf32> to vector<8x32xf32>
      %67 = arith.mulf %62, %66 : vector<8x32xf32>
      %c0_36 = arith.constant 0 : index
      %c0_37 = arith.constant 0 : index
      %68 = vector.load %arg9[%c0_36, %c0_37] : memref<1x32xf32, #tpu.memory_space<vmem>>, vector<1x32xf32>
      %69 = vector.broadcast %68 : vector<1x32xf32> to vector<8x32xf32>
      %70 = arith.mulf %67, %69 : vector<8x32xf32>
      %c0_38 = arith.constant 0 : index
      %c0_39 = arith.constant 0 : index
      %71 = vector.load %arg10[%c0_38, %c0_39] : memref<1x32xf32, #tpu.memory_space<vmem>>, vector<1x32xf32>
      %72 = vector.broadcast %71 : vector<1x32xf32> to vector<8x32xf32>
      %73 = arith.addf %70, %72 : vector<8x32xf32>
      %c0_40 = arith.constant 0 : index
      %c0_41 = arith.constant 0 : index
      %c0_42 = arith.constant 0 : index
      %74 = vector.load %arg11[%c0_40, %c0_41, %c0_42] : memref<1x8x32xf32, #tpu.memory_space<vmem>>, vector<1x8x32xf32>
      %75 = vector.shape_cast %74 : vector<1x8x32xf32> to vector<8x32xf32>
      %76 = vector.shape_cast %73 : vector<8x32xf32> to vector<1x8x32xf32>
      tpu.vector_store %arg11[%c0_40, %c0_41, %c0_42], %76 {strides = array<i32>} : memref<1x8x32xf32, #tpu.memory_space<vmem>>, vector<1x8x32xf32>,
    } else {
    }
    return
  }
  func.func @transform_0(%arg0: i32, %arg1: i32) -> (i32, i32, i32) {
    %c0_i32 = arith.constant 0 : i32
    %c0_i32_0 = arith.constant 0 : i32
    %c0_i32_1 = arith.constant 0 : i32
    return %arg0, %c0_i32, %c0_i32_0 : i32, i32, i32
  }
  func.func @transform_1(%arg0: i32, %arg1: i32) -> (i32, i32, i32) {
    %c0_i32 = arith.constant 0 : i32
    %c0_i32_0 = arith.constant 0 : i32
    %c0_i32_1 = arith.constant 0 : i32
    return %arg0, %c0_i32, %c0_i32_0 : i32, i32, i32
  }
  func.func @transform_2(%arg0: i32, %arg1: i32) -> (i32, i32, i32) {
    %c0_i32 = arith.constant 0 : i32
    %c0_i32_0 = arith.constant 0 : i32
    %c0_i32_1 = arith.constant 0 : i32
    %c0_i32_2 = arith.constant 0 : i32
    return %c0_i32, %c0_i32_0, %c0_i32_1 : i32, i32, i32
  }
  func.func @transform_3(%arg0: i32, %arg1: i32) -> (i32, i32, i32) {
    %c0_i32 = arith.constant 0 : i32
    %c0_i32_0 = arith.constant 0 : i32
    %c0_i32_1 = arith.constant 0 : i32
    %c0_i32_2 = arith.constant 0 : i32
    return %c0_i32, %c0_i32_0, %c0_i32_1 : i32, i32, i32
  }
  func.func @transform_4(%arg0: i32, %arg1: i32) -> (i32, i32, i32) {
    %c0_i32 = arith.constant 0 : i32
    %c0_i32_0 = arith.constant 0 : i32
    %c0_i32_1 = arith.constant 0 : i32
    %c0_i32_2 = arith.constant 0 : i32
    return %c0_i32, %c0_i32_0, %c0_i32_1 : i32, i32, i32
  }
  func.func @transform_5(%arg0: i32, %arg1: i32) -> (i32, i32, i32) {
    %c0_i32 = arith.constant 0 : i32
    %c0_i32_0 = arith.constant 0 : i32
    %c0_i32_1 = arith.constant 0 : i32
    %c0_i32_2 = arith.constant 0 : i32
    return %c0_i32, %c0_i32_0, %c0_i32_1 : i32, i32, i32
  }
  func.func @transform_6(%arg0: i32, %arg1: i32) -> (i32, i32) {
    %c0_i32 = arith.constant 0 : i32
    %c0_i32_0 = arith.constant 0 : i32
    %c0_i32_1 = arith.constant 0 : i32
    return %c0_i32, %c0_i32_0 : i32, i32
  }
  func.func @transform_7(%arg0: i32, %arg1: i32) -> (i32, i32) {
    %c0_i32 = arith.constant 0 : i32
    %c0_i32_0 = arith.constant 0 : i32
    %c0_i32_1 = arith.constant 0 : i32
    return %c0_i32, %c0_i32_0 : i32, i32
  }
  func.func @transform_8(%arg0: i32, %arg1: i32) -> (i32, i32) {
    %c0_i32 = arith.constant 0 : i32
    %c0_i32_0 = arith.constant 0 : i32
    %c0_i32_1 = arith.constant 0 : i32
    return %c0_i32, %c0_i32_0 : i32, i32
  }
  func.func @transform_9(%arg0: i32, %arg1: i32) -> (i32, i32, i32) {
    %c0_i32 = arith.constant 0 : i32
    %c0_i32_0 = arith.constant 0 : i32
    %c0_i32_1 = arith.constant 0 : i32
    return %arg0, %c0_i32, %c0_i32_0 : i32, i32, i32
  }
}

</mosaic_0001>

<bundles_post_ra>
// kernel: encoder_forward.9
= control target key start
LH: loop header
LB: loop body
LE: loop exit
PB: predicated region body
PF: predicated region fallthrough
CT: control target
= control target key end

     0   :  { %8 = vsyncpa [#allocation3], 0  ;;  %s519_s0 = inlined_call_operand.vmem [shape: f32[2,8,32], index: 0, kind: input, shape index: {}]   ;;  %s520_s1 = inlined_call_operand.vmem [shape: f32[1,32], index: 1, kind: input, shape index: {}]   ;;  %s521_s2 = inlined_call_operand.vmem [shape: f32[1,32], index: 2, kind: input, shape index: {}]   ;;  %s522_s3 = inlined_call_operand.hbm [shape: f32[2,8,32], index: 3, kind: output, shape index: {}]  }
   0x1   :  { %10 = vsyncpa [#allocation3 + $0x1], 0  ;;  %s410_s12 = smov 0   ;;  %s412_s13 = smov 0  }
   0x2   :  { %s414_s14 = smov 0   ;;  %s416_s15 = smov 0  }
   0x3 LB: > { %s431_s16 = sadd.s32 4294967295, %s387_s15   ;;  %s272_s17 = sadd.s32 4294967294, %s387_s15   ;;  %s387_s15 = sphi %s416_s15, %s528_s15   ;;  %s383_s14 = sphi %s414_s14, %s527_s14   ;;  %s379_s13 = sphi %s412_s13, %s526_s13   ;;  %s375_s12 = sphi %s410_s12, %s525_s12  }
   0x4   : > { %s435_s18 = sadd.s32 1, %s387_s15   ;;  %s91_s19 = sadd.s32 1, %s383_s14 }
   0x5   : > { %s88_s20 = ssub.s32 %s387_s15, %s435_s18  ;;  %p101_p0 = scmp.ne.s32.totalorder %s383_s14, %s379_s13 }
   0x6   : > { %p89_p1 = scmp.eq.s32.totalorder %s88_s20, 0  ;;  %p102_p2 = scmp.eq.s32.totalorder %s431_s16, 1 }
   0x7   : > { %p107_p3 = scmp.ne.s32.totalorder %s379_s13, %s375_s12  ;;  %p108_p4 = scmp.eq.s32.totalorder %s272_s17, 1 }
   0x8   : > { %s446_s21 = scalar_select %p89_p1, %s383_s14, %s91_s19  }
   0x9   : > { %p448_p5 = por %p102_p2, %p101_p0  ;;  %p452_p6 = por %p108_p4, %p107_p3 }
   0xa   : > { %p275_p7 = scmp.ge.s32.totalorder %s387_s15, 1  ;;  %p139_p8 = scmp.lt.s32.totalorder %s387_s15, 3 }
   0xc   : > { %p140_p9 = pnand %p275_p7, %p139_p8 }
   0xd   : > { %p162_p10 = scmp.lt.s32.totalorder (!%p140_p9), %s431_s16, 1  ;;  %vm167_vm0 = vcmask (!%p140_p9), 261120   ;;  %s159_s29 = sand.u32 (!%p140_p9), 1, %s379_s13   ;;  %v278_v11 = vld [vmem:[%s520_s1] ss:$0 sm:$0xff] (!%p140_p9) }
   0xe   : > { %143 = sbr.rel (%p140_p9) target bundleno = 353 (0x161), region = 32  ;;  %s276_s30 = sshll.u32 (!%p140_p9), %s159_s29, 3  ;;  %v279_v13 = vld [vmem:[%s521_s2] ss:$0 sm:$0xff] (!%p140_p9) }
   0xf   : > { %s281_s8 = sshll.u32 (!%p140_p9), %s431_s16, 7  ;;  %s161_s9 = scalar_lea.vmem (!%p140_p9), [#allocation2], %s276_s30 }
  0x10   : > { %s213_s10 = sshll.u32 (!%p140_p9), %s161_s9, 4  ;;  %s476_s19 = scalar_lea.hbm (!%p140_p9), %s522_s3, %s281_s8  ;;  %s478_s10 = int_to_ptr.vmem [resolvable:$true] %s213_s10 }
  0x11   : > { %s200_s20 = scalar_lea.sflag (!%p140_p9), [#allocation3], %s159_s29 }
  0x15   : > { %s163_s24 = scalar_select %p162_p10, %s431_s16, 1 }
  0x16   : > { %s389_s16 = smov [#allocation2]  }
  0x17   : > { %s277_s25 = sshll.u32 %s163_s24, 3  ;;  %s325_s24 = scalar_lea.vmem %s478_s10, 128 }
  0x18   : > { %s165_s28 = scalar_lea.vmem %s519_s0, %s277_s25  ;;  %p326_p11 = scmp.ne.s32.totalorder %s478_s10, %s325_s24 }
  0x19   : > { %v166_v0 = vld [vmem:[%s165_s28] sm:$0xff]  ;;  %s329_s25 = sshll.u32 %s389_s16, 4  ;;  %s330_s25 = int_to_ptr.vmem [resolvable:$false] %s329_s25 }
  0x1a   : > { %v168_v1 = vsel %vm167_vm0, %v166_v0, 0.0  ;;  %p327_p12 = pnand %p326_p11, %p448_p5  ;;  %s331_s26 = scalar_lea.vmem %s330_s25, 256 }
  0x1b   : > { %169 = vadd.xlane.f32.xlu0 %v168_v1  ;;  %p332_p0 = scmp.lt.s32.totalorder %s478_s10, %s330_s25  ;;  %p333_p1 = scmp.lt.s32.totalorder %s331_s26, %s325_s24 }
  0x1c   : > { %p328_p13 = pneg %p327_p12 }
  0x1d   : > { %p334_p2 = por %p333_p1, %p332_p0 }
  0x1f   : > { %p335_p3 = pnand %p334_p2, %p328_p13 }
  0xa8   : > { %v170_v2 = vpop.xlane.xlu0 %169 }
  0xa9   : > { %v172_v3 = vmul.f32 0.03125, %v170_v2 }
  0xab   : > { %v173_v4 = vsub.f32 %v166_v0, %v172_v3 }
  0xad   : > { %v174_v5 = vmul.f32 %v173_v4, %v173_v4 }
  0xaf   : > { %v175_v6 = vsel %vm167_vm0, %v174_v5, 0.0 }
  0xb0   : > { %176 = vadd.xlane.f32.xlu0 %v175_v6 }
 0x13d   : > { %v177_v7 = vpop.xlane.xlu0 %176 }
 0x13e   : > { %v178_v8 = vmul.f32 0.03125, %v177_v7 }
 0x140   : > { %v179_v9 = vadd.f32 1e-05, %v178_v8 }
 0x142   : > { %323 = vrsqrt.f32 %v179_v9 }
 0x14c   : > { %v324_v10 = vpop.eup %323 }
 0x14d   : > { %v181_v12 = vmul.f32 %v324_v10, %v173_v4 }
 0x14f   : > { %v189_v14 = vmul.f32 %v278_v11, %v181_v12 }
 0x151   : > { %v197_v15 = vadd.f32 %v279_v13, %v189_v14 }
 0x153   : > { %198 = vst.msk [vmem:[%s161_s9] sm:$0xff] %vm167_vm0, %v197_v15 }
 0x154   : > { %338 = shalt.err (!%p335_p3)
}
 0x155   : > { %s339_s27 = scalar_lea.hbm %s476_s19, 128  ;;  %s343_s30 = scalar_lea.hbm %s522_s3, 256 }
 0x156   : > { %p340_p4 = scmp.ne.s32.totalorder %s476_s19, %s339_s27  ;;  %p344_p9 = scmp.lt.u32.totalorder %s476_s19, %s522_s3 }
 0x157   : > { %p345_p10 = scmp.lt.u32.totalorder %s343_s30, %s339_s27  ;;  %p347_p12 = scmp.lt.u32.totalorder %s339_s27, %s476_s19 }
 0x158   : > { %p341_p7 = pnand %p340_p4, %p448_p5 }
 0x159   : > { %p346_p11 = por %p345_p10, %p344_p9 }
 0x15a   : > { %p342_p8 = pneg %p341_p7 }
 0x15b   : > { %p348_p13 = por %p347_p12, %p346_p11 }
 0x15d   : > { %p349_p0 = pnand %p348_p13, %p342_p8 }
 0x15f   : > { %352 = shalt.err (!%p349_p0)
}
 0x160   : > { %284 = dma.vmem_to_hbm [thread:$0]  (%p448_p5), %s478_s10, 128, %s476_s19, %s200_s20  }
 0x161 PF: > { %p290_p1 = scmp.ge.s32.totalorder %s387_s15, 2  ;;  %s225_s6 = sand.u32 1, %s375_s12  }
 0x162   : > { %s226_s7 = scalar_lea.sflag [#allocation3], %s225_s6 }
 0x163   : > { %p287_p2 = pnand %p290_p1, %p452_p6 }
 0x165   : > { %370 = dma.done.wait (!%p287_p2), %s226_s7, 128  }
 0x166   : > { %372 = vsyncadd (!%p287_p2), %s226_s7, 4294967168  ;;  %p13_p3 = scmp.ge.s32.totalorder %s435_s18, 4   ;;  %s525_s12 = smov %s379_s13 }
 0x167   : > { %s526_s13 = smov %s383_s14  ;;  %s527_s14 = smov %s446_s21 }
 0x168   : > { %s528_s15 = smov %s435_s18  ;;  %15 = sbr.rel (!%p13_p3) target bundleno = 3 (0x3), region = 67 }
 0x16f   :  { %231 = vsyncpa [#allocation3], 1 }
 0x170   :  { %233 = vsyncpa [#allocation3 + $0x1], 1 }

// kernel: encoder_forward.6
= control target key start
LH: loop header
LB: loop body
LE: loop exit
PB: predicated region body
PF: predicated region fallthrough
CT: control target
= control target key end

     0   :  { %s1876_s24 = smov 0   ;;  %s2091_s0 = inlined_call_operand.vmem [shape: f32[2,8,32], index: 0, kind: input, shape index: {}]   ;;  %s2092_s1 = inlined_call_operand.vmem [shape: f32[32,64], index: 1, kind: input, shape index: {}]   ;;  %s2093_s2 = inlined_call_operand.vmem [shape: f32[1,64], index: 2, kind: input, shape index: {}]   ;;  %s2094_s3 = inlined_call_operand.vmem [shape: f32[64,32], index: 3, kind: input, shape index: {}]   ;;  %s2095_s4 = inlined_call_operand.vmem [shape: f32[1,32], index: 4, kind: input, shape index: {}]   ;;  %s2096_s5 = inlined_call_operand.vmem [shape: f32[1,32], index: 5, kind: input, shape index: {}]   ;;  %s2097_s6 = inlined_call_operand.vmem [shape: f32[1,32], index: 6, kind: input, shape index: {}]   ;;  %s2098_s7 = inlined_call_operand.vmem [shape: f32[2,8,32], index: 7, kind: output, shape index: {}]  }
   0x1 LB: > { %s1417_s25 = sadd.s32 4294967295, %s1831_s24   ;;  %p1421_p0 = scmp.ge.s32.totalorder %s1831_s24, 1  ;;  %s1831_s24 = sphi %s1876_s24, %s17_s24  }
   0x2   : > { %p236_p1 = scmp.lt.s32.totalorder %s1831_s24, 3 }
   0x4   : > { %p237_p2 = pnand %p1421_p0, %p236_p1 }
   0x5   : > { %v275_v0 = vld [vmem:[%s2092_s1] sm:$0xff] (!%p237_p2)  ;;  %v276_v1 = vld [vmem:[%s2092_s1 + $0x8] sm:$0xff] (!%p237_p2)  ;;  %v277_v2 = vld [vmem:[%s2092_s1 + $0x10] sm:$0xff] (!%p237_p2)  ;;  %v1833_v3 = vmov (!%p237_p2), 0.0|0.0   ;;  %vm1834_vm0 = vmmov (!%p237_p2), 0   ;;  %v1835_v8 = vmov (!%p237_p2), 0.0  }
   0x6   : > { %240 = sbr.rel (%p237_p2) target bundleno = 864 (0x360), region = 48  ;;  %1700 = vmatprep.subr.bf16.mxu0 (!%p237_p2), %v1833_v3  ;;  %v291_v4 = vand.u32 (!%p237_p2), 4294901760, %v275_v0  ;;  %v294_v5 = vand.u32 (!%p237_p2), 4294901760, %v276_v1  ;;  %v278_v6 = vld [vmem:[%s2092_s1 + $0x18] sm:$0xff] (!%p237_p2)  ;;  %v297_v7 = vand.u32 (!%p237_p2), 4294901760, %v277_v2  ;;  %1533 = vmatprep.mubr.msk.f32.mxu0 (!%p237_p2), %vm1834_vm0, %v1835_v8  ;;  %p266_p3 = scmp.lt.s32.totalorder (!%p237_p2), %s1417_s25, 1 }
   0x7   : > { %v300_v9 = vand.u32 (!%p237_p2), 4294901760, %v278_v6  ;;  %1694 = vmatprep.subr.bf16.mxu1 (!%p237_p2), %v1833_v3  ;;  %1522 = vmatprep.mubr.msk.f32.mxu1 (!%p237_p2), %vm1834_vm0, %v1835_v8  ;;  %v776_v10 = vld [vmem:[%s2094_s3] sm:$0xff] (!%p237_p2)  ;;  %v777_v15 = vld [vmem:[%s2094_s3 + $0x8] sm:$0xff] (!%p237_p2)  ;;  %vm286_vm1 = vcmask (!%p237_p2), 261120   ;;  %v778_v48 = vld [vmem:[%s2094_s3 + $0x10] sm:$0xff] (!%p237_p2)  ;;  %vm791_vm2 = vcmask (!%p237_p2), 523264  }
   0x8   : > { %v1905_v11 = vsub.f32 (!%p237_p2), %v275_v0, %v291_v4  ;;  %v378_v12 = vsub.f32 (!%p237_p2), %v276_v1, %v294_v5  ;;  %v1907_v13 = vsub.f32 (!%p237_p2), %v277_v2, %v297_v7  ;;  %v1911_v14 = vpack.c.bf16 (!%p237_p2), %v294_v5, %v291_v4  ;;  %v779_v49 = vld [vmem:[%s2094_s3 + $0x18] sm:$0xff] (!%p237_p2)  ;;  %v780_v53 = vld [vmem:[%s2094_s3 + $0x20] sm:$0xff] (!%p237_p2)  ;;  %v781_v54 = vld [vmem:[%s2094_s3 + $0x28] sm:$0xff] (!%p237_p2) }
   0x9   : > { %v392_v16 = vsub.f32 (!%p237_p2), %v278_v6, %v300_v9  ;;  %v796_v17 = vand.u32 (!%p237_p2), 4294901760, %v776_v10  ;;  %v799_v22 = vand.u32 (!%p237_p2), 4294901760, %v777_v15  ;;  %v1698_v28 = vpack.c.bf16 (!%p237_p2), %v300_v9, %v297_v7  ;;  %v782_v58 = vld [vmem:[%s2094_s3 + $0x30] sm:$0xff] (!%p237_p2)  ;;  %v783_v59 = vld [vmem:[%s2094_s3 + $0x38] sm:$0xff] (!%p237_p2) }
   0xa   : > { %v372_v18 = vand.u32 (!%p237_p2), 4294901760, %v1905_v11  ;;  %v379_v19 = vand.u32 (!%p237_p2), 4294901760, %v378_v12  ;;  %v386_v20 = vand.u32 (!%p237_p2), 4294901760, %v1907_v13  ;;  %1696 = vmatpush3.bf16.msra.mxu1 (!%p237_p2), %v1911_v14  ;;  %v1707_v42 = vpack.c.bf16 (!%p237_p2), %v378_v12, %v1905_v11 }
   0xb   : > { %v393_v21 = vand.u32 (!%p237_p2), 4294901760, %v392_v16  ;;  %1697 = vmatprep.subr.bf16.mxu1 (!%p237_p2), %v1833_v3  ;;  %v1926_v23 = vsub.f32 (!%p237_p2), %v776_v10, %v796_v17  ;;  %v1934_v31 = vsub.f32 (!%p237_p2), %v777_v15, %v799_v22  ;;  %v1940_v44 = vpack.c.bf16 (!%p237_p2), %v799_v22, %v796_v17 }
   0xc   : > { %v373_v24 = vsub.f32 (!%p237_p2), %v1905_v11, %v372_v18  ;;  %v380_v25 = vsub.f32 (!%p237_p2), %v378_v12, %v379_v19  ;;  %v387_v26 = vsub.f32 (!%p237_p2), %v1907_v13, %v386_v20  ;;  %v1710_v45 = vpack.c.bf16 (!%p237_p2), %v392_v16, %v1907_v13 }
   0xd   : > { %s2100_s25 = smov (!%p266_p3, %s1417_s25), 1  ;;  %v394_v29 = vsub.f32 %v392_v16, %v393_v21  ;;  %v1719_v46 = vpack.c.bf16 %v379_v19, %v372_v18  ;;  %v1722_v47 = vpack.c.bf16 %v393_v21, %v386_v20  ;;  %v802_v50 = vand.u32 4294901760, %v778_v48 }
   0xe   : > { %s1422_s15 = sshll.u32 %s2100_s25, 3  ;;  %v374_v32 = vand.u32 4294901760, %v373_v24  ;;  %v381_v33 = vand.u32 4294901760, %v380_v25  ;;  %v388_v34 = vand.u32 4294901760, %v387_v26  ;;  %1699 = vmatpush3.bf16.msra.mxu1 %v1698_v28  ;;  %v805_v51 = vand.u32 4294901760, %v779_v49 }
   0xf   : > { %s269_s18 = scalar_lea.vmem %s2091_s0, %s1422_s15  ;;  %v395_v36 = vand.u32 4294901760, %v394_v29  ;;  %1730 = vmatprep.subr.bf16.mxu1 %v1833_v3  ;;  %v808_v55 = vand.u32 4294901760, %v780_v53  ;;  %v811_v56 = vand.u32 4294901760, %v781_v54  ;;  %v814_v60 = vand.u32 4294901760, %v782_v58  ;;  %s273_s21 = scalar_lea.vmem %s2098_s7, %s1422_s15 }
  0x10   : > { %v1930_v27 = vld [vmem:[%s269_s18] sm:$0xff]  ;;  %v1701_v37 = vpack.c.bf16 %v381_v33, %v374_v32  ;;  %v1975_v52 = vpack.c.bf16 %v805_v51, %v802_v50  ;;  %v817_v61 = vand.u32 4294901760, %v783_v59  ;;  %v2001_v63 = vsub.f32 %v778_v48, %v802_v50 }
  0x11   : > { %v288_v30 = vsel %vm286_vm1, %v1930_v27, 0  ;;  %v1704_v39 = vpack.c.bf16 %v395_v36, %v388_v34  ;;  %v1987_v57 = vpack.c.bf16 %v811_v56, %v808_v55  ;;  %v2003_v0 = vsub.f32 %v779_v49, %v805_v51  ;;  %v1424_v49 = vld [vmem:[%s2093_s2] ss:$0 sm:$0xff] }
  0x12   : > { %v359_v35 = vand.u32 4294901760, %v288_v30  ;;  %1702 = vmatpush3.bf16.msra.mxu0 %v1701_v37  ;;  %v1999_v62 = vpack.c.bf16 %v817_v61, %v814_v60  ;;  %v2005_v1 = vsub.f32 %v780_v53, %v808_v55  ;;  %v2007_v2 = vsub.f32 %v781_v54, %v811_v56 }
  0x13   : > { %1703 = vmatprep.subr.bf16.mxu0 %v1833_v3  ;;  %v2010_v4 = vsub.f32 %v782_v58, %v814_v60  ;;  %v2012_v5 = vsub.f32 %v783_v59, %v817_v61  ;;  %v881_v6 = vand.u32 4294901760, %v1926_v23  ;;  %v888_v7 = vand.u32 4294901760, %v1934_v31 }
  0x14   : > { %v360_v38 = vsub.f32 %v288_v30, %v359_v35  ;;  %v895_v13 = vand.u32 4294901760, %v2001_v63  ;;  %v909_v20 = vand.u32 4294901760, %v2005_v1  ;;  %v916_v21 = vand.u32 4294901760, %v2007_v2 }
  0x15   : > { %v882_v9 = vsub.f32 %v1926_v23, %v881_v6  ;;  %v889_v10 = vsub.f32 %v1934_v31, %v888_v7  ;;  %v923_v29 = vand.u32 4294901760, %v2010_v4  ;;  %v930_v30 = vand.u32 4294901760, %v2012_v5 }
  0x16   : > { %v361_v40 = vand.u32 4294901760, %v360_v38  ;;  %1705 = vmatpush3.bf16.msra.mxu0 %v1704_v39  ;;  %v896_v16 = vsub.f32 %v2001_v63, %v895_v13  ;;  %v910_v24 = vsub.f32 %v2005_v1, %v909_v20  ;;  %v917_v25 = vsub.f32 %v2007_v2, %v916_v21 }
  0x17   : > { %1706 = vmatprep.subr.bf16.mxu0 %v1833_v3  ;;  %v883_v11 = vand.u32 4294901760, %v882_v9  ;;  %v890_v12 = vand.u32 4294901760, %v889_v10  ;;  %v924_v33 = vsub.f32 %v2010_v4, %v923_v29  ;;  %v931_v34 = vsub.f32 %v2012_v5, %v930_v30 }
  0x18   : > { %v362_v41 = vsub.f32 %v360_v38, %v361_v40  ;;  %v897_v18 = vand.u32 4294901760, %v896_v16  ;;  %v911_v26 = vand.u32 4294901760, %v910_v24  ;;  %v1758_v39 = vpack.c.bf16 %v2003_v0, %v2001_v63 }
  0x19   : > { %1534 = vmatmul.mubr.f32.vlgmr.msra.gmra.mrb[0].mxu0 %v359_v35  ;;  %v1743_v15 = vpack.c.bf16 %v890_v12, %v883_v11  ;;  %v932_v36 = vand.u32 4294901760, %v931_v34 }
  0x1a   : > { %v363_v43 = vand.u32 4294901760, %v362_v41  ;;  %1708 = vmatpush3.bf16.msra.mxu0 %v1707_v42  ;;  %1544 = vmatprep.mubr.msk.f32.mxu0 %vm1834_vm0, %v1835_v8  ;;  %v1764_v41 = vpack.c.bf16 %v2012_v5, %v2010_v4  ;;  %v1779_v42 = vpack.c.bf16 %v888_v7, %v881_v6 }
  0x1b   : > { %1709 = vmatprep.subr.bf16.mxu0 %v1833_v3 }
  0x1c   : > { %1523 = vmatmul.mubr.f32.vlgmr.msra.gmra.mrb[0].mxu1 %v363_v43 }
  0x1d   : > { %1732 = vmatpush3.bf16.msra.mxu1 %v1940_v44  ;;  %1596 = vmatprep.mubr.msk.f32.mxu1 %vm1834_vm0, %v1835_v8 }
  0x1e   : > { %1733 = vmatprep.subr.bf16.mxu1 %v1833_v3  ;;  %1711 = vmatpush3.bf16.msra.mxu0 %v1710_v45  ;;  %v1785_v45 = vpack.c.bf16 %v916_v21, %v909_v20 }
  0x1f   : > { %1712 = vmatprep.subr.bf16.mxu0 %v1833_v3 }
  0x21   : > { %1545 = vmatmul.mubr.f32.vlgmr.msra.gmra.mrb[0].mxu0 %v360_v38  ;;  %1735 = vmatpush3.bf16.msra.mxu1 %v1975_v52  ;;  %v1755_v38 = vpack.c.bf16 %v1934_v31, %v1926_v23 }
  0x22   : > { %1714 = vmatpush3.bf16.msra.mxu0 %v1911_v14  ;;  %1555 = vmatprep.mubr.msk.f32.mxu0 %vm1834_vm0, %v1835_v8 }
  0x23   : > { %1715 = vmatprep.subr.bf16.mxu0 %v1833_v3  ;;  %1736 = vmatprep.subr.bf16.mxu1 %v1833_v3 }
  0x25   : > { %1738 = vmatpush3.bf16.msra.mxu1 %v1987_v57 }
  0x26   : > { %1717 = vmatpush3.bf16.msra.mxu0 %v1698_v28  ;;  %1739 = vmatprep.subr.bf16.mxu1 %v1833_v3 }
  0x27   : > { %1718 = vmatprep.subr.bf16.mxu0 %v1833_v3 }
  0x29   : > { %1556 = vmatmul.mubr.f32.vlgmr.msra.gmra.mrb[0].mxu0 %v361_v40  ;;  %1741 = vmatpush3.bf16.msra.mxu1 %v1999_v62  ;;  %v1761_v40 = vpack.c.bf16 %v2007_v2, %v2005_v1 }
  0x2a   : > { %1720 = vmatpush3.bf16.msra.mxu0 %v1719_v46  ;;  %1566 = vmatprep.mubr.msk.f32.mxu0 %vm1834_vm0, %v1835_v8  ;;  %v1788_v46 = vpack.c.bf16 %v930_v30, %v923_v29 }
  0x2b   : > { %1721 = vmatprep.subr.bf16.mxu0 %v1833_v3  ;;  %1742 = vmatprep.subr.bf16.mxu1 %v1833_v3 }
  0x2e   : > { %1723 = vmatpush3.bf16.msra.mxu0 %v1722_v47 }
  0x2f   : > { %1724 = vmatprep.subr.bf16.mxu0 %v1833_v3 }
  0x31   : > { %1567 = vmatmul.mubr.f32.vlgmr.msra.gmra.mrb[0].mxu0 %v359_v35 }
  0x32   : > { %1726 = vmatpush3.bf16.msra.mxu0 %v1911_v14  ;;  %1577 = vmatprep.mubr.msk.f32.mxu0 %vm1834_vm0, %v1835_v8  ;;  %v902_v14 = vand.u32 4294901760, %v2003_v0 }
  0x33   : > { %1727 = vmatprep.subr.bf16.mxu0 %v1833_v3 }
  0x34   : > { %v903_v17 = vsub.f32 %v2003_v0, %v902_v14  ;;  %v1782_v43 = vpack.c.bf16 %v902_v14, %v895_v13 }
  0x36   : > { %1729 = vmatpush3.bf16.msra.mxu0 %v1698_v28  ;;  %v904_v19 = vand.u32 4294901760, %v903_v17  ;;  %v918_v28 = vand.u32 4294901760, %v917_v25 }
  0x37   : > { %1766 = vmatprep.subr.bf16.mxu0 %v1833_v3 }
  0x38   : > { %v1746_v22 = vpack.c.bf16 %v904_v19, %v897_v18  ;;  %v1749_v32 = vpack.c.bf16 %v918_v28, %v911_v26  ;;  %v1427_v26 = vld [vmem:[%s2097_s6] ss:$0 sm:$0xff] }
  0x39   : > { %1578 = vmatmul.mubr.f32.vlgmr.msra.gmra.mrb[0].mxu0 %v359_v35  ;;  %v925_v35 = vand.u32 4294901760, %v924_v33 }
  0x3a   : > { %1768 = vmatpush3.bf16.msra.mxu0 %v1940_v44  ;;  %1653 = vmatprep.mubr.msk.f32.mxu0 %vm1834_vm0, %v1835_v8 }
  0x3b   : > { %1769 = vmatprep.subr.bf16.mxu0 %v1833_v3  ;;  %v1752_v37 = vpack.c.bf16 %v932_v36, %v925_v35 }
  0x3e   : > { %1771 = vmatpush3.bf16.msra.mxu0 %v1975_v52 }
  0x3f   : > { %1772 = vmatprep.subr.bf16.mxu0 %v1833_v3 }
  0x42   : > { %1774 = vmatpush3.bf16.msra.mxu0 %v1987_v57 }
  0x43   : > { %1775 = vmatprep.subr.bf16.mxu0 %v1833_v3 }
  0x46   : > { %1777 = vmatpush3.bf16.msra.mxu0 %v1999_v62 }
  0x47   : > { %1790 = vmatprep.subr.bf16.mxu0 %v1833_v3 }
  0xef   : > { %v365_v47 = vpop.f32.mrb[0].mxu1 }
  0xf0   : > { %v1524_v48 = vpop.f32.mrb[1].mxu1  ;;  %v366_v23 = vadd.f32 %v1424_v49, %v365_v47 }
 0x10c   : > { %v771_v31 = vpop.f32.mrb[0].mxu0 }
 0x10d   : > { %v1803_v50 = vadd.f32 %v771_v31, %v366_v23  ;;  %v1579_v51 = vpop.f32.mrb[1].mxu0 }
 0x10f   : > { %v775_v53 = vmax.f32 %v1803_v50, 0.0 }
 0x111   : > { %v793_v54 = vsel %vm791_vm2, %v775_v53, 0 }
 0x112   : > { %v868_v55 = vand.u32 4294901760, %v793_v54 }
 0x114   : > { %v869_v56 = vsub.f32 %v793_v54, %v868_v55 }
 0x116   : > { %v870_v58 = vand.u32 4294901760, %v869_v56 }
 0x118   : > { %1654 = vmatmul.mubr.f32.vlgmr.msra.gmra.mrb[2].mxu0 %v870_v58  ;;  %v871_v59 = vsub.f32 %v869_v56, %v870_v58 }
 0x119   : > { %1792 = vmatpush3.bf16.msra.mxu0 %v1940_v44  ;;  %1691 = vmatprep.mubr.msk.f32.mxu0 %vm1834_vm0, %v1835_v8 }
 0x11a   : > { %1793 = vmatprep.subr.bf16.mxu0 %v1833_v3  ;;  %v872_v60 = vand.u32 4294901760, %v871_v59 }
 0x11c   : > { %1597 = vmatmul.mubr.f32.vlgmr.msra.gmra.mrb[2].mxu1 %v872_v60 }
 0x11d   : > { %1744 = vmatpush3.bf16.msra.mxu1 %v1743_v15  ;;  %1795 = vmatpush3.bf16.msra.mxu0 %v1975_v52 }
 0x11e   : > { %1745 = vmatprep.subr.bf16.mxu1 %v1833_v3  ;;  %1796 = vmatprep.subr.bf16.mxu0 %v1833_v3 }
 0x11f   : > { %1615 = vmatprep.mubr.msk.f32.mxu1 %vm1834_vm0, %v1835_v8 }
 0x121   : > { %1747 = vmatpush3.bf16.msra.mxu1 %v1746_v22  ;;  %1798 = vmatpush3.bf16.msra.mxu0 %v1987_v57 }
 0x122   : > { %1748 = vmatprep.subr.bf16.mxu1 %v1833_v3  ;;  %1799 = vmatprep.subr.bf16.mxu0 %v1833_v3 }
 0x125   : > { %1750 = vmatpush3.bf16.msra.mxu1 %v1749_v32  ;;  %1801 = vmatpush3.bf16.msra.mxu0 %v1999_v62  ;;  %v1425_v62 = vld [vmem:[%s2095_s4] ss:$0 sm:$0xff] }
 0x126   : > { %1751 = vmatprep.subr.bf16.mxu1 %v1833_v3 }
 0x128   : > { %1692 = vmatmul.mubr.f32.vlgmr.msra.gmra.mrb[4].mxu0 %v868_v55 }
 0x129   : > { %1753 = vmatpush3.bf16.msra.mxu1 %v1752_v37 }
 0x12a   : > { %1754 = vmatprep.subr.bf16.mxu1 %v1833_v3 }
 0x12c   : > { %1616 = vmatmul.mubr.f32.vlgmr.msra.gmra.mrb[4].mxu1 %v868_v55 }
 0x12d   : > { %1756 = vmatpush3.bf16.msra.mxu1 %v1755_v38  ;;  %1634 = vmatprep.mubr.msk.f32.mxu1 %vm1834_vm0, %v1835_v8 }
 0x12e   : > { %1757 = vmatprep.subr.bf16.mxu1 %v1833_v3 }
 0x131   : > { %1759 = vmatpush3.bf16.msra.mxu1 %v1758_v39 }
 0x132   : > { %1760 = vmatprep.subr.bf16.mxu1 %v1833_v3 }
 0x135   : > { %1762 = vmatpush3.bf16.msra.mxu1 %v1761_v40 }
 0x136   : > { %1763 = vmatprep.subr.bf16.mxu1 %v1833_v3 }
 0x139   : > { %1765 = vmatpush3.bf16.msra.mxu1 %v1764_v41 }
 0x13a   : > { %1778 = vmatprep.subr.bf16.mxu1 %v1833_v3 }
 0x13c   : > { %1635 = vmatmul.mubr.f32.vlgmr.msra.gmra.mrb[6].mxu1 %v869_v56 }
 0x13d   : > { %1780 = vmatpush3.bf16.msra.mxu1 %v1779_v42  ;;  %1672 = vmatprep.mubr.msk.f32.mxu1 %vm1834_vm0, %v1835_v8 }
 0x13e   : > { %1781 = vmatprep.subr.bf16.mxu1 %v1833_v3 }
 0x141   : > { %1783 = vmatpush3.bf16.msra.mxu1 %v1782_v43 }
 0x142   : > { %1784 = vmatprep.subr.bf16.mxu1 %v1833_v3 }
 0x145   : > { %1786 = vmatpush3.bf16.msra.mxu1 %v1785_v45 }
 0x146   : > { %1787 = vmatprep.subr.bf16.mxu1 %v1833_v3 }
 0x149   : > { %1789 = vmatpush3.bf16.msra.mxu1 %v1788_v46 }
 0x14c   : > { %1673 = vmatmul.mubr.f32.vlgmr.msra.gmra.mrb[8].mxu1 %v868_v55 }
 0x1eb   : > { %v1154_v44 = vpop.f32.mrb[2].mxu0 }
 0x1ec   : > { %v1655_v52 = vpop.f32.mrb[3].mxu0 }
 0x1ef   : > { %v874_v57 = vpop.f32.mrb[2].mxu1 }
 0x1f0   : > { %v1598_v61 = vpop.f32.mrb[3].mxu1  ;;  %v875_v0 = vadd.f32 %v1425_v62, %v874_v57 }
 0x1fb   : > { %v1328_v63 = vpop.f32.mrb[4].mxu0 }
 0x1fc   : > { %v1693_v8 = vpop.f32.mrb[5].mxu0 }
 0x1ff   : > { %v985_v1 = vpop.f32.mrb[4].mxu1 }
 0x200   : > { %v986_v2 = vadd.f32 %v985_v1, %v875_v0  ;;  %v1617_v4 = vpop.f32.mrb[5].mxu1 }
 0x20f   : > { %v1073_v5 = vpop.f32.mrb[6].mxu1 }
 0x210   : > { %v1074_v6 = vadd.f32 %v1073_v5, %v986_v2  ;;  %v1636_v7 = vpop.f32.mrb[7].mxu1 }
 0x212   : > { %v1155_v3 = vadd.f32 %v1154_v44, %v1074_v6 }
 0x21f   : > { %v1249_v9 = vpop.f32.mrb[8].mxu1 }
 0x220   : > { %v1250_v10 = vadd.f32 %v1249_v9, %v1155_v3  ;;  %v1674_v11 = vpop.f32.mrb[9].mxu1 }
 0x222   : > { %v1329_v12 = vadd.f32 %v1328_v63, %v1250_v10 }
 0x224   : > { %v1332_v13 = vadd.f32 %v1329_v12, %v1930_v27  ;;  %v1426_v27 = vld [vmem:[%s2096_s5] ss:$0 sm:$0xff] }
 0x226   : > { %v1333_v14 = vsel %vm286_vm1, %v1332_v13, 0.0 }
 0x227   : > { %1334 = vadd.xlane.f32.xlu0 %v1333_v14 }
 0x2b4   : > { %v1335_v15 = vpop.xlane.xlu0 %1334 }
 0x2b5   : > { %v1337_v16 = vmul.f32 0.03125, %v1335_v15 }
 0x2b7   : > { %v1338_v17 = vsub.f32 %v1332_v13, %v1337_v16 }
 0x2b9   : > { %v1339_v18 = vmul.f32 %v1338_v17, %v1338_v17 }
 0x2bb   : > { %v1340_v19 = vsel %vm286_vm1, %v1339_v18, 0.0 }
 0x2bc   : > { %1341 = vadd.xlane.f32.xlu0 %v1340_v19 }
 0x349   : > { %v1342_v20 = vpop.xlane.xlu0 %1341 }
 0x34a   : > { %v1343_v21 = vmul.f32 0.03125, %v1342_v20 }
 0x34c   : > { %v1344_v22 = vadd.f32 1e-05, %v1343_v21 }
 0x34e   : > { %1823 = vrsqrt.f32 %v1344_v22 }
 0x358   : > { %v1824_v24 = vpop.eup %1823 }
 0x359   : > { %v1346_v25 = vmul.f32 %v1824_v24, %v1338_v17 }
 0x35b   : > { %v1354_v28 = vmul.f32 %v1426_v27, %v1346_v25 }
 0x35d   : > { %v1362_v29 = vadd.f32 %v1427_v26, %v1354_v28 }
 0x35f   : > { %1363 = vst.msk [vmem:[%s273_s21] sm:$0xff] %vm286_vm1, %v1362_v29 }
 0x360 PF: > { %s17_s24 = sadd.s32 1, %s1831_s24  }
 0x361   : > { %p14_p4 = scmp.ge.s32.totalorder %s17_s24, 4  }
 0x363   :  { %16 = sbr.rel (!%p14_p4) target bundleno = 1 (0x1), region = 78 }

// kernel: encoder_forward.5
= control target key start
LH: loop header
LB: loop body
LE: loop exit
PB: predicated region body
PF: predicated region fallthrough
CT: control target
= control target key end

     0   :  { %s4071_s30 = smov 0   ;;  %s4073_s10 = smov 0   ;;  %s4424_s0 = inlined_call_operand.vmem [shape: f32[2,8,32], index: 0, kind: input, shape index: {}]   ;;  %s4425_s1 = inlined_call_operand.vmem [shape: f32[2,1,8], index: 1, kind: input, shape index: {}]   ;;  %s4426_s2 = inlined_call_operand.vmem [shape: f32[4,32,8], index: 2, kind: input, shape index: {}]   ;;  %s4427_s3 = inlined_call_operand.vmem [shape: f32[4,32,8], index: 3, kind: input, shape index: {}]   ;;  %s4428_s4 = inlined_call_operand.vmem [shape: f32[4,32,8], index: 4, kind: input, shape index: {}]   ;;  %s4429_s5 = inlined_call_operand.vmem [shape: f32[4,8,32], index: 5, kind: input, shape index: {}]   ;;  %s4430_s6 = inlined_call_operand.vmem [shape: f32[1,32], index: 6, kind: input, shape index: {}]   ;;  %s4431_s7 = inlined_call_operand.vmem [shape: f32[1,32], index: 7, kind: input, shape index: {}]   ;;  %s4432_s8 = inlined_call_operand.vmem [shape: f32[1,32], index: 8, kind: input, shape index: {}]   ;;  %s4433_s9 = inlined_call_operand.vmem [shape: f32[2,8,32], index: 9, kind: output, shape index: {}]  }
   0x1   :  { %s4075_s11 = smov 0   ;;  %s4077_s12 = smov 0  }
   0x2   :  { %s4079_s13 = smov 0  }
   0x3 LB: > { %s28_s14 = sadd.s32 1, %s4007_s11  ;;  %s31_s15 = sadd.s32 1, %s4011_s12  ;;  %s4015_s13 = sphi %s4079_s13, %s19_s13   ;;  %s4011_s12 = sphi %s4077_s12, %s4437_s12   ;;  %s4007_s11 = sphi %s4075_s11, %s4436_s11   ;;  %s4003_s10 = sphi %s4073_s10, %s4435_s10   ;;  %s3999_s30 = sphi %s4071_s30, %s4434_s30  }
   0x4   : > { %p29_p0 = scmp.ge.s32.totalorder %s28_s14, 4  ;;  %p3342_p1 = scmp.ge.s32.totalorder %s4015_s13, 1 }
   0x5   : > { %p306_p2 = scmp.lt.s32.totalorder %s4015_s13, 9 }
   0x6   : > { %s4439_s14 = smov (%p29_p0, %s28_s14), 0  ;;  %s4441_s15 = smov (!%p29_p0, %s31_s15), %s4011_s12 }
   0x7   : > { %p307_p3 = pnand %p3342_p1, %p306_p2  ;;  %p33_p4 = scmp.ge.s32.totalorder %s4441_s15, 2 }
   0x8   : > { %s4104_s16 = sshll.u32 (!%p307_p3), %s3999_s30, 5  ;;  %p343_p5 = scmp.lt.s32.totalorder (!%p307_p3), %s4003_s10, 1  ;;  %v4017_v0 = vmov (!%p307_p3), 0.0|0.0   ;;  %vm4018_vm0 = vmmov (!%p307_p3), 0   ;;  %v4019_v4 = vmov (!%p307_p3), 0.0   ;;  %vm371_vm1 = vcmask (!%p307_p3), 261120  }
   0x9   : > { %s4443_s15 = smov (%p33_p4, %s4441_s15), 0  ;;  %310 = sbr.rel (%p307_p3) target bundleno = 1536 (0x600), region = 56 }
   0xa   : > { %3769 = vmatprep.subr.bf16.mxu0 (!%p307_p3), %v4017_v0  ;;  %s356_s19 = scalar_lea.vmem (!%p307_p3), %s4426_s2, %s4104_s16  ;;  %3805 = vmatprep.subr.bf16.mxu1 (!%p307_p3), %v4017_v0  ;;  %s361_s22 = scalar_lea.vmem (!%p307_p3), %s4427_s3, %s4104_s16  ;;  %vm1830_vm2 = vcmask (!%p307_p3), 64512  }
   0xb   : > { %v357_v1 = vld [vmem:[%s356_s19] sm:$0xff] (!%p307_p3)  ;;  %v358_v2 = vld [vmem:[%s356_s19 + $0x8] sm:$0xff] (!%p307_p3)  ;;  %3489 = vmatprep.mubr.msk.f32.mxu0 (!%p307_p3), %vm4018_vm0, %v4019_v4  ;;  %3555 = vmatprep.mubr.msk.f32.mxu1 (!%p307_p3), %vm4018_vm0, %v4019_v4  ;;  %v359_v9 = vld [vmem:[%s356_s19 + $0x10] sm:$0xff] (!%p307_p3)  ;;  %p3348_p6 = scmp.ne.s32.totalorder (!%p307_p3), %s3999_s30, 0 }
   0xc   : > { %v362_v3 = vld [vmem:[%s361_s22] sm:$0xff] (!%p307_p3)  ;;  %v376_v5 = vand.u32 (!%p307_p3), 4294901760, %v357_v1  ;;  %v379_v6 = vand.u32 (!%p307_p3), 4294901760, %v358_v2  ;;  %v363_v7 = vld [vmem:[%s361_s22 + $0x8] sm:$0xff] (!%p307_p3)  ;;  %v360_v10 = vld [vmem:[%s356_s19 + $0x18] sm:$0xff] (!%p307_p3)  ;;  %v382_v12 = vand.u32 (!%p307_p3), 4294901760, %v359_v9  ;;  %s366_s19 = scalar_lea.vmem (!%p307_p3), %s4428_s4, %s4104_s16 }
   0xd   : > { %v861_v8 = vand.u32 (!%p307_p3), 4294901760, %v362_v3  ;;  %v864_v11 = vand.u32 (!%p307_p3), 4294901760, %v363_v7  ;;  %v385_v13 = vand.u32 (!%p307_p3), 4294901760, %v360_v10  ;;  %v364_v14 = vld [vmem:[%s361_s22 + $0x10] sm:$0xff] (!%p307_p3)  ;;  %v365_v15 = vld [vmem:[%s361_s22 + $0x18] sm:$0xff] (!%p307_p3) }
   0xe   : > { %v4123_v16 = vpack.c.bf16 (!%p307_p3), %v379_v6, %v376_v5  ;;  %v4125_v17 = vsub.f32 (!%p307_p3), %v357_v1, %v376_v5  ;;  %v4127_v18 = vsub.f32 (!%p307_p3), %v358_v2, %v379_v6  ;;  %v4145_v23 = vsub.f32 (!%p307_p3), %v359_v9, %v382_v12 }
   0xf   : > { %v4129_v19 = vsub.f32 (!%p307_p3), %v362_v3, %v861_v8  ;;  %v4139_v20 = vpack.c.bf16 (!%p307_p3), %v864_v11, %v861_v8  ;;  %v4141_v21 = vsub.f32 (!%p307_p3), %v363_v7, %v864_v11  ;;  %v4143_v22 = vpack.c.bf16 (!%p307_p3), %v385_v13, %v382_v12  ;;  %v367_v11 = vld [vmem:[%s366_s19] sm:$0xff] (!%p307_p3)  ;;  %v368_v12 = vld [vmem:[%s366_s19 + $0x8] sm:$0xff] (!%p307_p3) }
  0x10   : > { %s4445_s10 = smov (!%p343_p5, %s4003_s10), 1  ;;  %3771 = vmatpush3.bf16.msra.mxu0 %v4123_v16  ;;  %v4150_v25 = vsub.f32 %v360_v10, %v385_v13  ;;  %v867_v26 = vand.u32 4294901760, %v364_v14  ;;  %v870_v27 = vand.u32 4294901760, %v365_v15  ;;  %v457_v30 = vand.u32 4294901760, %v4125_v17  ;;  %v369_v13 = vld [vmem:[%s366_s19 + $0x10] sm:$0xff] }
  0x11   : > { %s3343_s23 = sshll.u32 %s4445_s10, 3  ;;  %3807 = vmatpush3.bf16.msra.mxu1 %v4139_v20  ;;  %3772 = vmatprep.subr.bf16.mxu0 %v4017_v0  ;;  %v464_v31 = vand.u32 4294901760, %v4127_v18  ;;  %v942_v32 = vand.u32 4294901760, %v4129_v19  ;;  %v949_v36 = vand.u32 4294901760, %v4141_v21  ;;  %v471_v42 = vand.u32 4294901760, %v4145_v23  ;;  %s349_s21 = scalar_lea.vmem %s4425_s1, %s4445_s10 }
  0x12   : > { %s346_s26 = scalar_lea.vmem %s4424_s0, %s3343_s23  ;;  %s4137_s29 = scalar_lea.vmem %s4433_s9, %s3343_s23  ;;  %3808 = vmatprep.subr.bf16.mxu1 %v4017_v0  ;;  %v4162_v33 = vpack.c.bf16 %v870_v27, %v867_v26  ;;  %v4164_v34 = vsub.f32 %v364_v14, %v867_v26  ;;  %v4166_v35 = vsub.f32 %v365_v15, %v870_v27  ;;  %v458_v38 = vsub.f32 %v4125_v17, %v457_v30 }
  0x13   : > { %v4147_v24 = vld [vmem:[%s346_s26] sm:$0xff]  ;;  %v465_v39 = vsub.f32 %v4127_v18, %v464_v31  ;;  %v943_v40 = vsub.f32 %v4129_v19, %v942_v32  ;;  %v950_v41 = vsub.f32 %v4141_v21, %v949_v36  ;;  %v478_v43 = vand.u32 4294901760, %v4150_v25  ;;  %s3347_s10 = sshll.u32 %s3999_s30, 3 }
  0x14   : > { %v373_v28 = vsel %vm371_vm1, %v4147_v24, 0  ;;  %3774 = vmatpush3.bf16.msra.mxu0 %v4143_v22  ;;  %v956_v44 = vand.u32 4294901760, %v4164_v34  ;;  %v459_v46 = vand.u32 4294901760, %v458_v38  ;;  %v472_v50 = vsub.f32 %v4145_v23, %v471_v42  ;;  %s2753_s24 = scalar_lea.vmem %s4429_s5, %s3347_s10 }
  0x15   : > { %v4156_v29 = vand.u32 4294901760, %v373_v28  ;;  %3810 = vmatpush3.bf16.msra.mxu1 %v4162_v33  ;;  %3775 = vmatprep.subr.bf16.mxu0 %v4017_v0  ;;  %v466_v47 = vand.u32 4294901760, %v465_v39  ;;  %v944_v48 = vand.u32 4294901760, %v943_v40  ;;  %v951_v49 = vand.u32 4294901760, %v950_v41 }
  0x16   : > { %3811 = vmatprep.subr.bf16.mxu1 %v4017_v0  ;;  %v479_v51 = vsub.f32 %v4150_v25, %v478_v43  ;;  %v957_v52 = vsub.f32 %v4164_v34, %v956_v44  ;;  %v963_v54 = vand.u32 4294901760, %v4166_v35  ;;  %v473_v57 = vand.u32 4294901760, %v472_v50 }
  0x17   : > { %v4170_v37 = vsub.f32 %v373_v28, %v4156_v29  ;;  %v3776_v55 = vpack.c.bf16 %v466_v47, %v459_v46  ;;  %v3812_v56 = vpack.c.bf16 %v951_v49, %v944_v48  ;;  %v3782_v2 = vpack.c.bf16 %v4127_v18, %v4125_v17 }
  0x18   : > { %v480_v58 = vand.u32 4294901760, %v479_v51  ;;  %v958_v60 = vand.u32 4294901760, %v957_v52  ;;  %v964_v61 = vsub.f32 %v4166_v35, %v963_v54  ;;  %v3818_v3 = vpack.c.bf16 %v4141_v21, %v4129_v19 }
  0x19   : > { %v4191_v45 = vand.u32 4294901760, %v4170_v37  ;;  %v3785_v5 = vpack.c.bf16 %v4150_v25, %v4145_v23  ;;  %v3821_v6 = vpack.c.bf16 %v4166_v35, %v4164_v34  ;;  %v3794_v7 = vpack.c.bf16 %v464_v31, %v457_v30 }
  0x1a   : > { %v965_v62 = vand.u32 4294901760, %v964_v61  ;;  %v3779_v63 = vpack.c.bf16 %v480_v58, %v473_v57  ;;  %v3830_v8 = vpack.c.bf16 %v949_v36, %v942_v32  ;;  %v3797_v9 = vpack.c.bf16 %v478_v43, %v471_v42 }
  0x1b   : > { %v447_v53 = vsub.f32 %v4170_v37, %v4191_v45  ;;  %v3833_v10 = vpack.c.bf16 %v963_v54, %v956_v44  ;;  %v1346_v14 = vand.u32 4294901760, %v367_v11  ;;  %v1349_v15 = vand.u32 4294901760, %v368_v12 }
  0x1c   : > { %v3815_v1 = vpack.c.bf16 %v965_v62, %v958_v60  ;;  %v1352_v17 = vand.u32 4294901760, %v369_v13 }
  0x1d   : > { %v4206_v59 = vand.u32 4294901760, %v447_v53  ;;  %v3842_v19 = vpack.c.bf16 %v1349_v15, %v1346_v14  ;;  %v1433_v21 = vsub.f32 %v368_v12, %v1349_v15 }
  0x1f   : > { %3490 = vmatmul.mubr.f32.vlgmr.msra.gmra.mrb[0].mxu0 %v4206_v59  ;;  %3556 = vmatmul.mubr.f32.vlgmr.msra.gmra.mrb[0].mxu1 %v4206_v59  ;;  %v1434_v27 = vand.u32 4294901760, %v1433_v21 }
  0x20   : > { %3777 = vmatpush3.bf16.msra.mxu0 %v3776_v55  ;;  %3813 = vmatpush3.bf16.msra.mxu1 %v3812_v56 }
  0x21   : > { %3778 = vmatprep.subr.bf16.mxu0 %v4017_v0  ;;  %3814 = vmatprep.subr.bf16.mxu1 %v4017_v0  ;;  %v1435_v32 = vsub.f32 %v1433_v21, %v1434_v27 }
  0x22   : > { %3500 = vmatprep.mubr.msk.f32.mxu0 %vm4018_vm0, %v4019_v4  ;;  %3566 = vmatprep.mubr.msk.f32.mxu1 %vm4018_vm0, %v4019_v4 }
  0x23   : > { %v1436_v36 = vand.u32 4294901760, %v1435_v32 }
  0x24   : > { %3780 = vmatpush3.bf16.msra.mxu0 %v3779_v63  ;;  %3816 = vmatpush3.bf16.msra.mxu1 %v3815_v1  ;;  %v3346_v63 = vld [vmem:[%s349_s21] ss:$0 sm:$0xff] }
  0x25   : > { %3781 = vmatprep.subr.bf16.mxu0 %v4017_v0  ;;  %3817 = vmatprep.subr.bf16.mxu1 %v4017_v0 }
  0x27   : > { %3501 = vmatmul.mubr.f32.vlgmr.msra.gmra.mrb[0].mxu0 %v4156_v29  ;;  %3567 = vmatmul.mubr.f32.vlgmr.msra.gmra.mrb[0].mxu1 %v4156_v29 }
  0x28   : > { %3783 = vmatpush3.bf16.msra.mxu0 %v3782_v2  ;;  %3819 = vmatpush3.bf16.msra.mxu1 %v3818_v3 }
  0x29   : > { %3784 = vmatprep.subr.bf16.mxu0 %v4017_v0  ;;  %3820 = vmatprep.subr.bf16.mxu1 %v4017_v0 }
  0x2a   : > { %3511 = vmatprep.mubr.msk.f32.mxu0 %vm4018_vm0, %v4019_v4  ;;  %3577 = vmatprep.mubr.msk.f32.mxu1 %vm4018_vm0, %v4019_v4 }
  0x2c   : > { %3786 = vmatpush3.bf16.msra.mxu0 %v3785_v5  ;;  %3822 = vmatpush3.bf16.msra.mxu1 %v3821_v6 }
  0x2d   : > { %3787 = vmatprep.subr.bf16.mxu0 %v4017_v0  ;;  %3823 = vmatprep.subr.bf16.mxu1 %v4017_v0 }
  0x2f   : > { %3512 = vmatmul.mubr.f32.vlgmr.msra.gmra.mrb[0].mxu0 %v4170_v37  ;;  %3578 = vmatmul.mubr.f32.vlgmr.msra.gmra.mrb[0].mxu1 %v4170_v37 }
  0x30   : > { %3789 = vmatpush3.bf16.msra.mxu0 %v4123_v16  ;;  %3825 = vmatpush3.bf16.msra.mxu1 %v4139_v20 }
  0x31   : > { %3790 = vmatprep.subr.bf16.mxu0 %v4017_v0  ;;  %3826 = vmatprep.subr.bf16.mxu1 %v4017_v0 }
  0x32   : > { %3522 = vmatprep.mubr.msk.f32.mxu0 %vm4018_vm0, %v4019_v4  ;;  %3588 = vmatprep.mubr.msk.f32.mxu1 %vm4018_vm0, %v4019_v4 }
  0x34   : > { %3792 = vmatpush3.bf16.msra.mxu0 %v4143_v22  ;;  %3828 = vmatpush3.bf16.msra.mxu1 %v4162_v33 }
  0x35   : > { %3793 = vmatprep.subr.bf16.mxu0 %v4017_v0  ;;  %3829 = vmatprep.subr.bf16.mxu1 %v4017_v0 }
  0x37   : > { %3523 = vmatmul.mubr.f32.vlgmr.msra.gmra.mrb[0].mxu0 %v4191_v45  ;;  %3589 = vmatmul.mubr.f32.vlgmr.msra.gmra.mrb[0].mxu1 %v4191_v45 }
  0x38   : > { %3795 = vmatpush3.bf16.msra.mxu0 %v3794_v7  ;;  %3831 = vmatpush3.bf16.msra.mxu1 %v3830_v8 }
  0x39   : > { %3796 = vmatprep.subr.bf16.mxu0 %v4017_v0  ;;  %3832 = vmatprep.subr.bf16.mxu1 %v4017_v0 }
  0x3a   : > { %3533 = vmatprep.mubr.msk.f32.mxu0 %vm4018_vm0, %v4019_v4  ;;  %3599 = vmatprep.mubr.msk.f32.mxu1 %vm4018_vm0, %v4019_v4 }
  0x3c   : > { %3798 = vmatpush3.bf16.msra.mxu0 %v3797_v9  ;;  %3834 = vmatpush3.bf16.msra.mxu1 %v3833_v10 }
  0x3d   : > { %3799 = vmatprep.subr.bf16.mxu0 %v4017_v0  ;;  %3835 = vmatprep.subr.bf16.mxu1 %v4017_v0 }
  0x3f   : > { %3534 = vmatmul.mubr.f32.vlgmr.msra.gmra.mrb[0].mxu0 %v4156_v29  ;;  %3600 = vmatmul.mubr.f32.vlgmr.msra.gmra.mrb[0].mxu1 %v4156_v29 }
  0x40   : > { %3801 = vmatpush3.bf16.msra.mxu0 %v4123_v16  ;;  %3837 = vmatpush3.bf16.msra.mxu1 %v4139_v20  ;;  %v370_v16 = vld [vmem:[%s366_s19 + $0x18] sm:$0xff]  ;;  %v1426_v20 = vsub.f32 %v367_v11, %v1346_v14 }
  0x41   : > { %3802 = vmatprep.subr.bf16.mxu0 %v4017_v0  ;;  %3838 = vmatprep.subr.bf16.mxu1 %v4017_v0  ;;  %v1355_v18 = vand.u32 4294901760, %v370_v16 }
  0x42   : > { %3544 = vmatprep.mubr.msk.f32.mxu0 %vm4018_vm0, %v4019_v4  ;;  %3610 = vmatprep.mubr.msk.f32.mxu1 %vm4018_vm0, %v4019_v4  ;;  %v1427_v26 = vand.u32 4294901760, %v1426_v20  ;;  %v3854_v42 = vpack.c.bf16 %v1433_v21, %v1426_v20  ;;  %v2754_v21 = vld [vmem:[%s2753_s24] sm:$0xff] }
  0x43   : > { %v1447_v23 = vsub.f32 %v370_v16, %v1355_v18  ;;  %v3845_v25 = vpack.c.bf16 %v1355_v18, %v1352_v17 }
  0x44   : > { %3804 = vmatpush3.bf16.msra.mxu0 %v4143_v22  ;;  %3840 = vmatpush3.bf16.msra.mxu1 %v4162_v33  ;;  %v1440_v22 = vsub.f32 %v369_v13, %v1352_v17  ;;  %v1428_v31 = vsub.f32 %v1426_v20, %v1427_v26  ;;  %v3866_v44 = vpack.c.bf16 %v1434_v27, %v1427_v26 }
  0x45   : > { %3679 = vmatprep.subr.mxu1 %v4019_v4  ;;  %3841 = vmatprep.subr.bf16.mxu0 %v4017_v0  ;;  %v1448_v30 = vand.u32 4294901760, %v1447_v23 }
  0x46   : > { %v1441_v28 = vand.u32 4294901760, %v1440_v22  ;;  %v1429_v35 = vand.u32 4294901760, %v1428_v31  ;;  %v3857_v43 = vpack.c.bf16 %v1447_v23, %v1440_v22 }
  0x47   : > { %3545 = vmatmul.mubr.f32.vlgmr.msra.gmra.mrb[0].mxu0 %v4156_v29  ;;  %3611 = vmatmul.mubr.f32.vlgmr.msra.gmra.mrb[0].mxu1 %v4156_v29  ;;  %v1449_v34 = vsub.f32 %v1447_v23, %v1448_v30 }
  0x48   : > { %3681 = vmatprep.mubr.msk.f32.mxu1 %vm4018_vm0, %v4019_v4  ;;  %3621 = vmatprep.mubr.msk.f32.mxu0 %vm4018_vm0, %v4019_v4  ;;  %v1442_v33 = vsub.f32 %v1440_v22, %v1441_v28  ;;  %v3848_v40 = vpack.c.bf16 %v1436_v36, %v1429_v35  ;;  %v3869_v46 = vpack.c.bf16 %v1448_v30, %v1441_v28  ;;  %v2759_v22 = vand.u32 4294901760, %v2754_v21 }
  0x49   : > { %3843 = vmatpush3.bf16.msra.mxu0 %v3842_v19  ;;  %v1450_v39 = vand.u32 4294901760, %v1449_v34 }
  0x4a   : > { %3844 = vmatprep.subr.bf16.mxu0 %v4017_v0  ;;  %v1443_v38 = vand.u32 4294901760, %v1442_v33  ;;  %v2836_v23 = vsub.f32 %v2754_v21, %v2759_v22 }
  0x4c   : > { %v3851_v41 = vpack.c.bf16 %v1450_v39, %v1443_v38 }
  0x4d   : > { %3846 = vmatpush3.bf16.msra.mxu0 %v3845_v25 }
  0x4e   : > { %3847 = vmatprep.subr.bf16.mxu0 %v4017_v0 }
  0x50   : > { %3622 = vmatmul.mubr.f32.vlgmr.msra.gmra.mrb[2].mxu0 %v4206_v59 }
  0x51   : > { %3849 = vmatpush3.bf16.msra.mxu0 %v3848_v40  ;;  %3632 = vmatprep.mubr.msk.f32.mxu0 %vm4018_vm0, %v4019_v4 }
  0x52   : > { %3850 = vmatprep.subr.bf16.mxu0 %v4017_v0 }
  0x55   : > { %3852 = vmatpush3.bf16.msra.mxu0 %v3851_v41 }
  0x56   : > { %3853 = vmatprep.subr.bf16.mxu0 %v4017_v0 }
  0x58   : > { %3633 = vmatmul.mubr.f32.vlgmr.msra.gmra.mrb[2].mxu0 %v4156_v29 }
  0x59   : > { %3855 = vmatpush3.bf16.msra.mxu0 %v3854_v42  ;;  %3643 = vmatprep.mubr.msk.f32.mxu0 %vm4018_vm0, %v4019_v4 }
  0x5a   : > { %3856 = vmatprep.subr.bf16.mxu0 %v4017_v0 }
  0x5d   : > { %3858 = vmatpush3.bf16.msra.mxu0 %v3857_v43 }
  0x5e   : > { %3859 = vmatprep.subr.bf16.mxu0 %v4017_v0 }
  0x60   : > { %3644 = vmatmul.mubr.f32.vlgmr.msra.gmra.mrb[2].mxu0 %v4170_v37 }
  0x61   : > { %3861 = vmatpush3.bf16.msra.mxu0 %v3842_v19  ;;  %3654 = vmatprep.mubr.msk.f32.mxu0 %vm4018_vm0, %v4019_v4 }
  0x62   : > { %3862 = vmatprep.subr.bf16.mxu0 %v4017_v0 }
  0x65   : > { %3864 = vmatpush3.bf16.msra.mxu0 %v3845_v25 }
  0x66   : > { %3865 = vmatprep.subr.bf16.mxu0 %v4017_v0 }
  0x68   : > { %3655 = vmatmul.mubr.f32.vlgmr.msra.gmra.mrb[2].mxu0 %v4191_v45 }
  0x69   : > { %3867 = vmatpush3.bf16.msra.mxu0 %v3866_v44  ;;  %3665 = vmatprep.mubr.msk.f32.mxu0 %vm4018_vm0, %v4019_v4 }
  0x6a   : > { %3868 = vmatprep.subr.bf16.mxu0 %v4017_v0 }
  0x6d   : > { %3870 = vmatpush3.bf16.msra.mxu0 %v3869_v46 }
  0x6e   : > { %3871 = vmatprep.subr.bf16.mxu0 %v4017_v0 }
  0x70   : > { %3666 = vmatmul.mubr.f32.vlgmr.msra.gmra.mrb[2].mxu0 %v4156_v29 }
  0x71   : > { %3873 = vmatpush3.bf16.msra.mxu0 %v3842_v19  ;;  %3676 = vmatprep.mubr.msk.f32.mxu0 %vm4018_vm0, %v4019_v4 }
  0x72   : > { %3874 = vmatprep.subr.bf16.mxu0 %v4017_v0 }
  0x75   : > { %3876 = vmatpush3.bf16.msra.mxu0 %v3845_v25  ;;  %v2837_v25 = vand.u32 4294901760, %v2836_v23 }
  0x76   : > { %3739 = vmatprep.subr.mxu0 %v4019_v4 }
  0x77   : > { %v2838_v26 = vsub.f32 %v2836_v23, %v2837_v25 }
  0x78   : > { %3677 = vmatmul.mubr.f32.vlgmr.msra.gmra.mrb[2].mxu0 %v4156_v29 }
  0x79   : > { %3741 = vmatprep.mubr.msk.f32.mxu0 %vm4018_vm0, %v4019_v4  ;;  %3740 = vmatpush3.msra.mxu0 %v2759_v22  ;;  %v2839_v27 = vand.u32 4294901760, %v2838_v26 }
  0x7a   : > { %3749 = vmatprep.subr.mxu0 %v4019_v4 }
 0x11a   : > { %v856_v37 = vpop.f32.mrb[0].mxu0  ;;  %v1341_v45 = vpop.f32.mrb[0].mxu1 }
 0x11b   : > { %v1832_v47 = vsel %vm1830_vm2, %v856_v37, 0  ;;  %v1835_v48 = vsel %vm1830_vm2, %v1341_v45, 0  ;;  %v3546_v49 = vpop.f32.mrb[1].mxu0  ;;  %v3612_v50 = vpop.f32.mrb[1].mxu1 }
 0x11c   : > { %v1903_v51 = vand.u32 4294901760, %v1832_v47  ;;  %v1838_v52 = vand.u32 4294901760, %v1835_v48 }
 0x11e   : > { %v1904_v0 = vsub.f32 %v1832_v47, %v1903_v51  ;;  %v1915_v53 = vsub.f32 %v1835_v48, %v1838_v52  ;;  %3680 = vmatpush3.xpose.msra.mxu1 %v1838_v52 }
 0x11f   : > { %3684 = vmatprep.subr.mxu1 %v4019_v4 }
 0x120   : > { %v1905_v29 = vand.u32 4294901760, %v1904_v0  ;;  %v1916_v54 = vand.u32 4294901760, %v1915_v53 }
 0x122   : > { %v1906_v55 = vsub.f32 %v1904_v0, %v1905_v29  ;;  %v1917_v56 = vsub.f32 %v1915_v53, %v1916_v54 }
 0x124   : > { %v1907_v57 = vand.u32 4294901760, %v1906_v55  ;;  %v1918_v58 = vand.u32 4294901760, %v1917_v56 }
 0x126   : > { %3682 = vmatmul.mubr.f32.vlgmr.msra.gmra.mrb[2].mxu1 %v1907_v57 }
 0x127   : > { %3685 = vmatpush3.xpose.msra.mxu1 %v1918_v58  ;;  %3686 = vmatprep.mubr.msk.f32.mxu1 %vm4018_vm0, %v4019_v4 }
 0x128   : > { %3689 = vmatprep.subr.mxu1 %v4019_v4 }
 0x12e   : > { %3687 = vmatmul.mubr.f32.vlgmr.msra.gmra.mrb[2].mxu1 %v1903_v51 }
 0x12f   : > { %3690 = vmatpush3.xpose.msra.mxu1 %v1915_v53  ;;  %3691 = vmatprep.mubr.msk.f32.mxu1 %vm4018_vm0, %v4019_v4 }
 0x130   : > { %3694 = vmatprep.subr.mxu1 %v4019_v4 }
 0x136   : > { %3692 = vmatmul.mubr.f32.vlgmr.msra.gmra.mrb[2].mxu1 %v1904_v0 }
 0x137   : > { %3695 = vmatpush3.xpose.msra.mxu1 %v1838_v52  ;;  %3696 = vmatprep.mubr.msk.f32.mxu1 %vm4018_vm0, %v4019_v4 }
 0x138   : > { %3699 = vmatprep.subr.mxu1 %v4019_v4 }
 0x13e   : > { %3697 = vmatmul.mubr.f32.vlgmr.msra.gmra.mrb[2].mxu1 %v1905_v29 }
 0x13f   : > { %3700 = vmatpush3.xpose.msra.mxu1 %v1916_v54  ;;  %3701 = vmatprep.mubr.msk.f32.mxu1 %vm4018_vm0, %v4019_v4 }
 0x140   : > { %3704 = vmatprep.subr.mxu1 %v4019_v4 }
 0x146   : > { %3702 = vmatmul.mubr.f32.vlgmr.msra.gmra.mrb[2].mxu1 %v1903_v51 }
 0x147   : > { %3705 = vmatpush3.xpose.msra.mxu1 %v1838_v52  ;;  %3706 = vmatprep.mubr.msk.f32.mxu1 %vm4018_vm0, %v4019_v4 }
 0x148   : > { %3709 = vmatprep.subr.mxu1 %v4019_v4 }
 0x14b   : > { %v1826_v59 = vpop.f32.mrb[2].mxu0 }
 0x14c   : > { %v2305_v60 = vand.u32 4294901760, %v1826_v59  ;;  %v3678_v61 = vpop.f32.mrb[3].mxu0 }
 0x14e   : > { %3707 = vmatmul.mubr.f32.vlgmr.msra.gmra.mrb[2].mxu1 %v1903_v51  ;;  %v2382_v9 = vsub.f32 %v1826_v59, %v2305_v60 }
 0x14f   : > { %3711 = vmatprep.mubr.msk.f32.mxu1 %vm4018_vm0, %v4019_v4  ;;  %3710 = vmatpush3.msra.mxu1 %v2305_v60 }
 0x150   : > { %3714 = vmatprep.subr.mxu1 %v4019_v4  ;;  %v2383_v14 = vand.u32 4294901760, %v2382_v9 }
 0x152   : > { %v2384_v17 = vsub.f32 %v2382_v9, %v2383_v14 }
 0x154   : > { %v2385_v20 = vand.u32 4294901760, %v2384_v17 }
 0x221   : > { %v2279_v62 = vpop.f32.mrb[2].mxu1 }
 0x222   : > { %v2283_v1 = vmul.f32 0.35355338, %v2279_v62  ;;  %v3708_v2 = vpop.f32.mrb[3].mxu1 }
 0x224   : > { %v2291_v3 = vadd.f32 %v3346_v63, %v2283_v1 }
 0x226   : > { %v2292_v5 = vsel %vm1830_vm2, %v2291_v3, -inf }
 0x227   : > { %2293 = vmax.xlane.f32.xlu0 %v2292_v5 }
 0x2b4   : > { %v2294_v6 = vpop.xlane.xlu0 %2293 }
 0x2b5   : > { %v2295_v7 = vsub.f32 %v2291_v3, %v2294_v6 }
 0x2b7   : > { %v2296_v8 = vmul.f32 1.442695, %v2295_v7 }
 0x2b9   : > { %3971 = vpow2.f32 %v2296_v8 }
 0x2c3   : > { %v3972_v10 = vpop.eup %3971 }
 0x2c4   : > { %v2302_v11 = vsel %vm1830_vm2, %v3972_v10, 0  ;;  %v2298_v12 = vsel %vm1830_vm2, %v3972_v10, 0.0 }
 0x2c5   : > { %v2370_v13 = vand.u32 4294901760, %v2302_v11  ;;  %2299 = vadd.xlane.f32.xlu0 %v2298_v12 }
 0x2c7   : > { %v2371_v15 = vsub.f32 %v2302_v11, %v2370_v13 }
 0x2c9   : > { %v2372_v16 = vand.u32 4294901760, %v2371_v15 }
 0x2cb   : > { %v2373_v18 = vsub.f32 %v2371_v15, %v2372_v16 }
 0x2cd   : > { %v2374_v19 = vand.u32 4294901760, %v2373_v18 }
 0x2cf   : > { %3712 = vmatmul.mubr.f32.vlgmr.msra.gmra.mrb[4].mxu1 %v2374_v19 }
 0x2d0   : > { %3715 = vmatpush3.msra.mxu1 %v2385_v20  ;;  %3716 = vmatprep.mubr.msk.f32.mxu1 %vm4018_vm0, %v4019_v4 }
 0x2d1   : > { %3719 = vmatprep.subr.mxu1 %v4019_v4 }
 0x2d7   : > { %3717 = vmatmul.mubr.f32.vlgmr.msra.gmra.mrb[4].mxu1 %v2370_v13 }
 0x2d8   : > { %3720 = vmatpush3.msra.mxu1 %v2382_v9  ;;  %3721 = vmatprep.mubr.msk.f32.mxu1 %vm4018_vm0, %v4019_v4 }
 0x2d9   : > { %3724 = vmatprep.subr.mxu1 %v4019_v4 }
 0x2df   : > { %3722 = vmatmul.mubr.f32.vlgmr.msra.gmra.mrb[4].mxu1 %v2371_v15 }
 0x2e0   : > { %3725 = vmatpush3.msra.mxu1 %v2305_v60  ;;  %3726 = vmatprep.mubr.msk.f32.mxu1 %vm4018_vm0, %v4019_v4 }
 0x2e1   : > { %3729 = vmatprep.subr.mxu1 %v4019_v4 }
 0x2e7   : > { %3727 = vmatmul.mubr.f32.vlgmr.msra.gmra.mrb[4].mxu1 %v2372_v16 }
 0x2e8   : > { %3730 = vmatpush3.msra.mxu1 %v2383_v14  ;;  %3731 = vmatprep.mubr.msk.f32.mxu1 %vm4018_vm0, %v4019_v4 }
 0x2e9   : > { %3734 = vmatprep.subr.mxu1 %v4019_v4 }
 0x2ef   : > { %3732 = vmatmul.mubr.f32.vlgmr.msra.gmra.mrb[4].mxu1 %v2370_v13 }
 0x2f0   : > { %3735 = vmatpush3.msra.mxu1 %v2305_v60  ;;  %3736 = vmatprep.mubr.msk.f32.mxu1 %vm4018_vm0, %v4019_v4 }
 0x2f1   : > { %3744 = vmatprep.subr.mxu1 %v4019_v4 }
 0x2f7   : > { %3737 = vmatmul.mubr.f32.vlgmr.msra.gmra.mrb[4].mxu1 %v2370_v13 }
 0x2f8   : > { %3746 = vmatprep.mubr.msk.f32.mxu1 %vm4018_vm0, %v4019_v4  ;;  %3745 = vmatpush3.msra.mxu1 %v2839_v27 }
 0x2f9   : > { %3754 = vmatprep.subr.mxu1 %v4019_v4 }
 0x352   : > { %v2300_v28 = vpop.xlane.xlu0 %2299 }
 0x353   : > { %3973 = vrcp.f32 %v2300_v28 }
 0x35d   : > { %v3974_v30 = vpop.eup %3973 }
 0x3ca   : > { %v2746_v31 = vpop.f32.mrb[4].mxu1 }
 0x3cb   : > { %v2751_v32 = vmul.f32 %v3974_v30, %v2746_v31  ;;  %v3738_v33 = vpop.f32.mrb[5].mxu1 }
 0x3cd   : > { %v2756_v34 = vsel %vm1830_vm2, %v2751_v32, 0 }
 0x3ce   : > { %v2824_v35 = vand.u32 4294901760, %v2756_v34 }
 0x3d0   : > { %v2825_v36 = vsub.f32 %v2756_v34, %v2824_v35  ;;  %3747 = vmatmul.mubr.f32.vlgmr.msra.gmra.mrb[6].mxu1 %v2824_v35 }
 0x3d1   : > { %3755 = vmatpush3.msra.mxu1 %v2759_v22  ;;  %3756 = vmatprep.mubr.msk.f32.mxu1 %vm4018_vm0, %v4019_v4 }
 0x3d2   : > { %v2826_v38 = vand.u32 4294901760, %v2825_v36  ;;  %3764 = vmatprep.subr.mxu1 %v4019_v4 }
 0x3d4   : > { %3757 = vmatmul.mubr.f32.vlgmr.msra.gmra.mrb[8].mxu1 %v2826_v38  ;;  %v2827_v39 = vsub.f32 %v2825_v36, %v2826_v38 }
 0x3d5   : > { %3765 = vmatpush3.msra.mxu1 %v2759_v22  ;;  %3766 = vmatprep.mubr.msk.f32.mxu1 %vm4018_vm0, %v4019_v4 }
 0x3d6   : > { %v2828_v40 = vand.u32 4294901760, %v2827_v39 }
 0x3d8   : > { %3742 = vmatmul.mubr.f32.vlgmr.msra.gmra.mrb[4].mxu0 %v2828_v40  ;;  %3767 = vmatmul.mubr.f32.vlgmr.msra.gmra.mrb[10].mxu1 %v2824_v35 }
 0x3d9   : > { %3750 = vmatpush3.msra.mxu0 %v2836_v23  ;;  %3751 = vmatprep.mubr.msk.f32.mxu0 %vm4018_vm0, %v4019_v4 }
 0x3da   : > { %3759 = vmatprep.subr.mxu0 %v4019_v4 }
 0x3dc   : > { %3752 = vmatmul.mubr.f32.vlgmr.msra.gmra.mrb[6].mxu0 %v2825_v36 }
 0x3dd   : > { %3760 = vmatpush3.msra.mxu0 %v2837_v25  ;;  %3761 = vmatprep.mubr.msk.f32.mxu0 %vm4018_vm0, %v4019_v4  ;;  %v4020_v4 = vmov (!%p3348_p6), 0.0  }
 0x3de   : > { %3208 = vst.msk [vmem:[#allocation2] sm:$0xff] (!%p3348_p6), %vm371_vm1, %v4020_v4 }
 0x3e0   : > { %3762 = vmatmul.mubr.f32.vlgmr.msra.gmra.mrb[8].mxu0 %v2824_v35 }
 0x4a3   : > { %v2906_v41 = vpop.f32.mrb[6].mxu1 }
 0x4a4   : > { %v3748_v42 = vpop.f32.mrb[7].mxu1 }
 0x4a7   : > { %v3054_v43 = vpop.f32.mrb[8].mxu1 }
 0x4a8   : > { %v3758_v44 = vpop.f32.mrb[9].mxu1 }
 0x4ab   : > { %v2830_v46 = vpop.f32.mrb[4].mxu0  ;;  %v3200_v37 = vpop.f32.mrb[10].mxu1 }
 0x4ac   : > { %v2907_v45 = vadd.f32 %v2906_v41, %v2830_v46  ;;  %v3743_v47 = vpop.f32.mrb[5].mxu0  ;;  %v3768_v48 = vpop.f32.mrb[11].mxu1 }
 0x4af   : > { %v2980_v49 = vpop.f32.mrb[6].mxu0 }
 0x4b0   : > { %v2981_v50 = vadd.f32 %v2980_v49, %v2907_v45  ;;  %v3753_v51 = vpop.f32.mrb[7].mxu0  ;;  %3207 = sbr.rel (%p3348_p6) target bundleno = 1207 (0x4b7), region = 60 }
 0x4b2   : > { %v3055_v52 = vadd.f32 %v3054_v43, %v2981_v50 }
 0x4b3   : > { %v3128_v0 = vpop.f32.mrb[8].mxu0 }
 0x4b4   : > { %v3129_v53 = vadd.f32 %v3128_v0, %v3055_v52  ;;  %v3763_v29 = vpop.f32.mrb[9].mxu0 }
 0x4b6   : > { %v3201_v54 = vadd.f32 %v3200_v37, %v3129_v53 }
 0x4b7 PF: > { %v3209_v55 = vld [vmem:[#allocation2] sm:$0xff]  ;;  %p3349_p7 = scmp.ne.s32.totalorder %s3999_s30, 3 }
 0x4b8   : > { %v3210_v56 = vadd.f32 %v3209_v55, %v3201_v54  ;;  %v3350_v58 = vld [vmem:[%s4430_s6] ss:$0 sm:$0xff] (!%p3349_p7) }
 0x4b9   : > { %3215 = sbr.rel (%p3349_p7) target bundleno = 1536 (0x600), region = 64  ;;  %v3352_v10 = vld [vmem:[%s4432_s8] ss:$0 sm:$0xff] (!%p3349_p7) }
 0x4ba   : > { %3211 = vst.msk [vmem:[#allocation2] sm:$0xff] %vm371_vm1, %v3210_v56 }
 0x4c1   : > { %v3216_v57 = vld [vmem:[#allocation2] sm:$0xff] }
 0x4c2   : > { %v3224_v59 = vadd.f32 %v3350_v58, %v3216_v57 }
 0x4c4   : > { %v3225_v60 = vadd.f32 %v3224_v59, %v4147_v24  ;;  %v3351_v24 = vld [vmem:[%s4431_s7] ss:$0 sm:$0xff] }
 0x4c6   : > { %v3226_v61 = vsel %vm371_vm1, %v3225_v60, 0.0 }
 0x4c7   : > { %3227 = vadd.xlane.f32.xlu0 %v3226_v61 }
 0x554   : > { %v3228_v62 = vpop.xlane.xlu0 %3227 }
 0x555   : > { %v3230_v63 = vmul.f32 0.03125, %v3228_v62 }
 0x557   : > { %v3231_v1 = vsub.f32 %v3225_v60, %v3230_v63 }
 0x559   : > { %v3232_v2 = vmul.f32 %v3231_v1, %v3231_v1 }
 0x55b   : > { %v3233_v3 = vsel %vm371_vm1, %v3232_v2, 0.0 }
 0x55c   : > { %3234 = vadd.xlane.f32.xlu0 %v3233_v3 }
 0x5e9   : > { %v3235_v5 = vpop.xlane.xlu0 %3234 }
 0x5ea   : > { %v3236_v6 = vmul.f32 0.03125, %v3235_v5 }
 0x5ec   : > { %v3237_v7 = vadd.f32 1e-05, %v3236_v6 }
 0x5ee   : > { %3975 = vrsqrt.f32 %v3237_v7 }
 0x5f8   : > { %v3976_v8 = vpop.eup %3975 }
 0x5f9   : > { %v3239_v9 = vmul.f32 %v3976_v8, %v3231_v1 }
 0x5fb   : > { %v3247_v11 = vmul.f32 %v3351_v24, %v3239_v9 }
 0x5fd   : > { %v3255_v12 = vadd.f32 %v3352_v10, %v3247_v11 }
 0x5ff   : > { %3256 = vst.msk [vmem:[%s4137_s29] sm:$0xff] %vm371_vm1, %v3255_v12 }
 0x600 PF: > { %s19_s13 = sadd.s32 1, %s4015_s13   ;;  %s4434_s30 = smov %s4007_s11 }
 0x601   : > { %p16_p8 = scmp.ge.s32.totalorder %s19_s13, 10   ;;  %s4435_s10 = smov %s4011_s12 }
 0x602   : > { %s4436_s11 = smov %s4439_s14  ;;  %s4437_s12 = smov %s4443_s15 }
 0x603   :  { %18 = sbr.rel (!%p16_p8) target bundleno = 3 (0x3), region = 101 }

</bundles_post_ra>
